<compile_context>
chip_gen: v6e
topology: v6e:2x2x1
jax: 0.10.0
libtpu: 0.0.40
codegen_flags: <defaults>
</compile_context>

<pallas_src>
import jax
import jax.numpy as jnp
from jax.experimental import pallas as pl
from jax.experimental.pallas import tpu as pltpu


# ------------------------------ fused kernel --------------------------------

def _cnn_fused_kernel(x1_ref, r1_ref, m1_ref, b1_ref, s1_ref, p1_ref,
                      r2_ref, m2_ref, b2_ref, s2_ref, p2_ref,
                      fsel_ref, fc1w_ref, fc1b_ref, fc2w_ref, fc2b_ref,
                      out_ref):
    def mm(a, b):
        return jnp.dot(a, b, preferred_element_type=jnp.float32)

    # x1: (N*H, Cin*(W+2)) W-padded, channel-major-lane layout (built wrapper-
    # side; pure layout plumbing).
    x1 = x1_ref[...]                                               # (32, 72)

    # conv1 (3x3, pad 1) + ReLU : implicit im2col via banded matmuls
    acc1 = mm(mm(r1_ref[0], x1), m1_ref[0])
    for dy in range(1, r1_ref.shape[0]):
        acc1 = acc1 + mm(mm(r1_ref[dy], x1), m1_ref[dy])
    y1 = jnp.maximum(acc1 + b1_ref[...], 0.0)                      # (32, 128)

    # maxpool1 2x2 (rows via S1, lanes via P1; P1 also inserts conv2's
    # W-padding, so x2 is already in conv2's expected layout)
    t1 = jnp.maximum(mm(s1_ref[0], y1), mm(s1_ref[1], y1))         # (16, 128)
    x2 = jnp.maximum(mm(t1, p1_ref[0]), mm(t1, p1_ref[1]))         # (16, 80)

    # conv2 (3x3, pad 1) + ReLU
    acc2 = mm(mm(r2_ref[0], x2), m2_ref[0])
    for dy in range(1, r2_ref.shape[0]):
        acc2 = acc2 + mm(mm(r2_ref[dy], x2), m2_ref[dy])
    y2 = jnp.maximum(acc2 + b2_ref[...], 0.0)                      # (16, 128)

    # maxpool2 2x2
    t2 = jnp.maximum(mm(s2_ref[0], y2), mm(s2_ref[1], y2))         # (8, 128)
    q = jnp.maximum(mm(t2, p2_ref[0]), mm(t2, p2_ref[1]))          # (8, 64)

    # flatten (torch.flatten(x,1) / NCHW order, folded into the pre-permuted
    # fc1 weights) + fc1 + ReLU.  fsel[hh] gathers spatial row hh of each image.
    z = mm(mm(fsel_ref[0], q), fc1w_ref[0])
    for hh in range(1, fsel_ref.shape[0]):
        z = z + mm(mm(fsel_ref[hh], q), fc1w_ref[hh])
    z = jnp.maximum(z + fc1b_ref[...], 0.0)                        # (2, 32)

    # fc2 -> logits
    out_ref[...] = (mm(z, fc2w_ref[...]) + fc2b_ref[...]).astype(out_ref.dtype)


# ------------------- parameter-only layout plumbing (plain JAX) -------------

def _conv_row_shift(n_img, h, dy):
    # (n_img*h, n_img*h): row (n, ho) selects input row (n, ho + dy - 1),
    # zero row outside the image (== zero padding in H, no batch bleed).
    return jnp.kron(jnp.eye(n_img, dtype=jnp.float32),
                    jnp.eye(h, h, k=dy - 1, dtype=jnp.float32))


def _conv_band(w_oihw, w_in):
    # (kh, cin*(w_in+2), cout*w_in):
    #   M_dy[ci*(w_in+2) + (wo + dx), co*w_in + wo] = w[co, ci, dy, dx]
    cout, cin, kh, kw = w_oihw.shape
    wp = w_in + 2
    mats = []
    for dy in range(kh):
        m = jnp.zeros((cin * wp, cout * w_in), jnp.float32)
        for dx in range(kw):
            shift = jnp.eye(wp, w_in, k=-dx, dtype=jnp.float32)
            m = m + jnp.kron(w_oihw[:, :, dy, dx].T, shift)
        mats.append(m)
    return jnp.stack(mats)


def _pool_rows(n_img, h_out, parity):
    # (n_img*h_out, n_img*2*h_out): row (n, ho) selects row (n, 2*ho + parity)
    s = jnp.zeros((h_out, 2 * h_out), jnp.float32)
    s = s.at[jnp.arange(h_out), 2 * jnp.arange(h_out) + parity].set(1.0)
    return jnp.kron(jnp.eye(n_img, dtype=jnp.float32), s)


def _pool_cols(c, w_in, parity, out_stride, out_off):
    # (c*w_in, c*out_stride): lane (ch, 2*wo+parity) -> lane (ch, out_off+wo)
    w_out = w_in // 2
    p = jnp.zeros((w_in, out_stride), jnp.float32)
    p = p.at[2 * jnp.arange(w_out) + parity, out_off + jnp.arange(w_out)].set(1.0)
    return jnp.kron(jnp.eye(c, dtype=jnp.float32), p)


def _flatten_rows(n_img, h_out, h_idx):
    # (n_img, n_img*h_out): row n selects pooled row (n, h_idx)
    f = jnp.zeros((n_img, n_img * h_out), jnp.float32)
    f = f.at[jnp.arange(n_img), jnp.arange(n_img) * h_out + h_idx].set(1.0)
    return f


def _layout_input(x_nchw):
    # (N, C, H, W) -> (N*H, C*(W+2)): W-padded, channel-major-lane 2-D slab
    # X1[n*H + row, ci*(W+2) + 1 + col] = x[n, ci, row, col].
    n, c, h, w = x_nchw.shape
    xp = jnp.pad(x_nchw, ((0, 0), (0, 0), (0, 0), (1, 1)))
    return xp.transpose(0, 2, 1, 3).reshape(n * h, c * (w + 2))


def prepare_params(params, batch, h1=16):
    """Build the banded / selection matrices the fused kernel consumes.

    Pure parameter preprocessing (layout plumbing) — can be hoisted out of the
    step and reused across calls with the same batch size."""
    w1, b1 = params["conv1_w"], params["conv1_b"]
    w2, b2 = params["conv2_w"], params["conv2_b"]
    c2 = w1.shape[0]                 # 8
    c3 = w2.shape[0]                 # 16
    h2, h3 = h1 // 2, h1 // 4        # 8, 4
    n_hidden = params["fc1_w"].shape[1]

    fc1w = params["fc1_w"].reshape(c3, h3, h3, n_hidden)
    fc1w = fc1w.transpose(1, 0, 2, 3).reshape(h3, c3 * h3, n_hidden)

    return {
        "r1": jnp.stack([_conv_row_shift(batch, h1, dy) for dy in range(3)]),
        "m1": _conv_band(w1, h1),
        "b1t": jnp.repeat(b1, h1)[None, :],
        "s1": jnp.stack([_pool_rows(batch, h2, b) for b in (0, 1)]),
        "p1": jnp.stack([_pool_cols(c2, h1, b, out_stride=h2 + 2, out_off=1)
                         for b in (0, 1)]),
        "r2": jnp.stack([_conv_row_shift(batch, h2, dy) for dy in range(3)]),
        "m2": _conv_band(w2, h2),
        "b2t": jnp.repeat(b2, h2)[None, :],
        "s2": jnp.stack([_pool_rows(batch, h3, b) for b in (0, 1)]),
        "p2": jnp.stack([_pool_cols(c3, h2, b, out_stride=h3, out_off=0)
                         for b in (0, 1)]),
        "fsel": jnp.stack([_flatten_rows(batch, h3, hh) for hh in range(h3)]),
        "fc1w": fc1w,
        "fc1b": params["fc1_b"][None, :],
        "fc2w": params["fc2_w"],
        "fc2b": params["fc2_b"][None, :],
    }


# ------------------------------ forward pass ---------------------------------

def cnn_forward(params, x_nchw):
    """Mirrors CNN.forward (conv/relu/pool x2, flatten(1), fc/relu, fc)."""
    n, _, h1, _ = x_nchw.shape
    c = prepare_params(params, n, h1)
    x1 = _layout_input(x_nchw)
    n_cls = params["fc2_w"].shape[1]
    vmem = pl.BlockSpec(memory_space=pltpu.MemorySpace.VMEM)
    return pl.pallas_call(
        _cnn_fused_kernel,
        out_shape=jax.ShapeDtypeStruct((n, n_cls), jnp.float32),
        in_specs=[vmem] * 16,
        out_specs=vmem,
    )(x1, c["r1"], c["m1"], c["b1t"], c["s1"], c["p1"],
      c["r2"], c["m2"], c["b2t"], c["s2"], c["p2"],
      c["fsel"], c["fc1w"], c["fc1b"], c["fc2w"], c["fc2b"])
    # TODO(synk): train()/test()/run() (optimizer, CrossEntropyLoss,
    # classification_report) are host-side training utilities, not part of
    # the forward kernel.


def cnn_forward_reference(params, x):
    """Pure-JAX reference of the same forward pass (self-check only)."""
    hp = jax.lax.Precision.HIGHEST

    def conv(v, w, b):
        y = jax.lax.conv_general_dilated(
            v, w, window_strides=(1, 1), padding=((1, 1), (1, 1)),
            dimension_numbers=("NCHW", "OIHW", "NCHW"), precision=hp)
        return jax.nn.relu(y + b[None, :, None, None])

    def pool(v):
        n, c, h, w = v.shape
        return v.reshape(n, c, h // 2, 2, w // 2, 2).max(axis=(3, 5))

    y = pool(conv(x, params["conv1_w"], params["conv1_b"]))
    y = pool(conv(y, params["conv2_w"], params["conv2_b"]))
    y = y.reshape(y.shape[0], -1)                       # torch.flatten(x, 1)
    y = jax.nn.relu(jnp.dot(y, params["fc1_w"], precision=hp) + params["fc1_b"])
    return jnp.dot(y, params["fc2_w"], precision=hp) + params["fc2_b"]


# ------------------------------- parameters ----------------------------------

def init_params(key):
    ks = jax.random.split(key, 8)

    def u(k, shape, fan_in):  # PyTorch-style uniform(-1/sqrt(fan_in), 1/sqrt(fan_in))
        bound = 1.0 / float(fan_in) ** 0.5
        return jax.random.uniform(k, shape, jnp.float32, -bound, bound)

    return {
        "conv1_w": u(ks[0], (8, 4, 3, 3), 4 * 3 * 3),
        "conv1_b": u(ks[1], (8,), 4 * 3 * 3),
        "conv2_w": u(ks[2], (16, 8, 3, 3), 8 * 3 * 3),
        "conv2_b": u(ks[3], (16,), 8 * 3 * 3),
        "fc1_w":   u(ks[4], (16 * 4 * 4, 32), 16 * 4 * 4),  # stored (in, out)
        "fc1_b":   u(ks[5], (32,), 16 * 4 * 4),
        "fc2_w":   u(ks[6], (32, 10), 32),
        "fc2_b":   u(ks[7], (10,), 32),
    }


if __name__ == "__main__":
    key = jax.random.PRNGKey(0)
    k_x, k_p = jax.random.split(key)
    x = jax.random.normal(k_x, (2, 4, 16, 16), dtype=jnp.float32)   # NCHW input
    params = init_params(k_p)

    fwd = jax.jit(cnn_forward)
    out = jax.block_until_ready(fwd(params, x))
    assert out.shape == (2, 10) and out.dtype == jnp.float32

    ref = jax.block_until_ready(jax.jit(cnn_forward_reference)(params, x))
    assert jnp.allclose(out, ref, rtol=2e-2, atol=2e-2), (out, ref)
    print("KERNEL_OK")
</pallas_src>

<mosaic_0001>
module attributes {stable_mosaic.version = 11 : i64} {
  func.func @_cnn_fused_kernel(%arg0: memref<32x72xf32, #tpu.memory_space<vmem>>, %arg1: memref<3x32x32xf32, #tpu.memory_space<vmem>>, %arg2: memref<3x72x128xf32, #tpu.memory_space<vmem>>, %arg3: memref<1x128xf32, #tpu.memory_space<vmem>>, %arg4: memref<2x16x32xf32, #tpu.memory_space<vmem>>, %arg5: memref<2x128x80xf32, #tpu.memory_space<vmem>>, %arg6: memref<3x16x16xf32, #tpu.memory_space<vmem>>, %arg7: memref<3x80x128xf32, #tpu.memory_space<vmem>>, %arg8: memref<1x128xf32, #tpu.memory_space<vmem>>, %arg9: memref<2x8x16xf32, #tpu.memory_space<vmem>>, %arg10: memref<2x128x64xf32, #tpu.memory_space<vmem>>, %arg11: memref<4x2x8xf32, #tpu.memory_space<vmem>>, %arg12: memref<4x64x32xf32, #tpu.memory_space<vmem>>, %arg13: memref<1x32xf32, #tpu.memory_space<vmem>>, %arg14: memref<32x10xf32, #tpu.memory_space<vmem>>, %arg15: memref<1x10xf32, #tpu.memory_space<vmem>>, %arg16: memref<2x10xf32, #tpu.memory_space<vmem>>) attributes {dimension_semantics = [], scalar_prefetch = 0 : i64, scratch_operands = 0 : i64, tpu.core_type = #tpu.core_type<tc>} {
    %c0 = arith.constant 0 : index
    %c0_0 = arith.constant 0 : index
    %0 = vector.load %arg0[%c0, %c0_0] : memref<32x72xf32, #tpu.memory_space<vmem>>, vector<32x72xf32>
    %c0_1 = arith.constant 0 : index
    %c0_2 = arith.constant 0 : index
    %c0_3 = arith.constant 0 : index
    %1 = vector.load %arg1[%c0_1, %c0_2, %c0_3] : memref<3x32x32xf32, #tpu.memory_space<vmem>>, vector<1x32x32xf32>
    %2 = vector.shape_cast %1 : vector<1x32x32xf32> to vector<32x32xf32>
    %cst = arith.constant dense<0.000000e+00> : vector<32x72xf32>
    %3 = tpu.matmul %2, %0, %cst {dimension_numbers = #tpu.dot_dimension_numbers<[1], [0], [0], [1], [0, 0, 1, 1], [], []>} : vector<32x32xf32>, vector<32x72xf32>, vector<32x72xf32> -> vector<32x72xf32>
    %c0_4 = arith.constant 0 : index
    %c0_5 = arith.constant 0 : index
    %c0_6 = arith.constant 0 : index
    %4 = vector.load %arg2[%c0_4, %c0_5, %c0_6] : memref<3x72x128xf32, #tpu.memory_space<vmem>>, vector<1x72x128xf32>
    %5 = vector.shape_cast %4 : vector<1x72x128xf32> to vector<72x128xf32>
    %cst_7 = arith.constant dense<0.000000e+00> : vector<32x128xf32>
    %6 = tpu.matmul %3, %5, %cst_7 {dimension_numbers = #tpu.dot_dimension_numbers<[1], [0], [0], [1], [0, 0, 1, 1], [], []>} : vector<32x72xf32>, vector<72x128xf32>, vector<32x128xf32> -> vector<32x128xf32>
    %c1 = arith.constant 1 : index
    %c0_8 = arith.constant 0 : index
    %c0_9 = arith.constant 0 : index
    %7 = vector.load %arg1[%c1, %c0_8, %c0_9] : memref<3x32x32xf32, #tpu.memory_space<vmem>>, vector<1x32x32xf32>
    %8 = vector.shape_cast %7 : vector<1x32x32xf32> to vector<32x32xf32>
    %cst_10 = arith.constant dense<0.000000e+00> : vector<32x72xf32>
    %9 = tpu.matmul %8, %0, %cst_10 {dimension_numbers = #tpu.dot_dimension_numbers<[1], [0], [0], [1], [0, 0, 1, 1], [], []>} : vector<32x32xf32>, vector<32x72xf32>, vector<32x72xf32> -> vector<32x72xf32>
    %c1_11 = arith.constant 1 : index
    %c0_12 = arith.constant 0 : index
    %c0_13 = arith.constant 0 : index
    %10 = vector.load %arg2[%c1_11, %c0_12, %c0_13] : memref<3x72x128xf32, #tpu.memory_space<vmem>>, vector<1x72x128xf32>
    %11 = vector.shape_cast %10 : vector<1x72x128xf32> to vector<72x128xf32>
    %cst_14 = arith.constant dense<0.000000e+00> : vector<32x128xf32>
    %12 = tpu.matmul %9, %11, %cst_14 {dimension_numbers = #tpu.dot_dimension_numbers<[1], [0], [0], [1], [0, 0, 1, 1], [], []>} : vector<32x72xf32>, vector<72x128xf32>, vector<32x128xf32> -> vector<32x128xf32>
    %13 = arith.addf %6, %12 : vector<32x128xf32>
    %c2 = arith.constant 2 : index
    %c0_15 = arith.constant 0 : index
    %c0_16 = arith.constant 0 : index
    %14 = vector.load %arg1[%c2, %c0_15, %c0_16] : memref<3x32x32xf32, #tpu.memory_space<vmem>>, vector<1x32x32xf32>
    %15 = vector.shape_cast %14 : vector<1x32x32xf32> to vector<32x32xf32>
    %cst_17 = arith.constant dense<0.000000e+00> : vector<32x72xf32>
    %16 = tpu.matmul %15, %0, %cst_17 {dimension_numbers = #tpu.dot_dimension_numbers<[1], [0], [0], [1], [0, 0, 1, 1], [], []>} : vector<32x32xf32>, vector<32x72xf32>, vector<32x72xf32> -> vector<32x72xf32>
    %c2_18 = arith.constant 2 : index
    %c0_19 = arith.constant 0 : index
    %c0_20 = arith.constant 0 : index
    %17 = vector.load %arg2[%c2_18, %c0_19, %c0_20] : memref<3x72x128xf32, #tpu.memory_space<vmem>>, vector<1x72x128xf32>
    %18 = vector.shape_cast %17 : vector<1x72x128xf32> to vector<72x128xf32>
    %cst_21 = arith.constant dense<0.000000e+00> : vector<32x128xf32>
    %19 = tpu.matmul %16, %18, %cst_21 {dimension_numbers = #tpu.dot_dimension_numbers<[1], [0], [0], [1], [0, 0, 1, 1], [], []>} : vector<32x72xf32>, vector<72x128xf32>, vector<32x128xf32> -> vector<32x128xf32>
    %20 = arith.addf %13, %19 : vector<32x128xf32>
    %c0_22 = arith.constant 0 : index
    %c0_23 = arith.constant 0 : index
    %21 = vector.load %arg3[%c0_22, %c0_23] : memref<1x128xf32, #tpu.memory_space<vmem>>, vector<1x128xf32>
    %22 = vector.broadcast %21 : vector<1x128xf32> to vector<32x128xf32>
    %23 = arith.addf %20, %22 : vector<32x128xf32>
    %cst_24 = arith.constant 0.000000e+00 : f32
    %24 = vector.broadcast %cst_24 : f32 to vector<32x128xf32>
    %25 = arith.maximumf %23, %24 : vector<32x128xf32>
    %c0_25 = arith.constant 0 : index
    %c0_26 = arith.constant 0 : index
    %c0_27 = arith.constant 0 : index
    %26 = vector.load %arg4[%c0_25, %c0_26, %c0_27] : memref<2x16x32xf32, #tpu.memory_space<vmem>>, vector<1x16x32xf32>
    %27 = vector.shape_cast %26 : vector<1x16x32xf32> to vector<16x32xf32>
    %cst_28 = arith.constant dense<0.000000e+00> : vector<16x128xf32>
    %28 = tpu.matmul %27, %25, %cst_28 {dimension_numbers = #tpu.dot_dimension_numbers<[1], [0], [0], [1], [0, 0, 1, 1], [], []>} : vector<16x32xf32>, vector<32x128xf32>, vector<16x128xf32> -> vector<16x128xf32>
    %c1_29 = arith.constant 1 : index
    %c0_30 = arith.constant 0 : index
    %c0_31 = arith.constant 0 : index
    %29 = vector.load %arg4[%c1_29, %c0_30, %c0_31] : memref<2x16x32xf32, #tpu.memory_space<vmem>>, vector<1x16x32xf32>
    %30 = vector.shape_cast %29 : vector<1x16x32xf32> to vector<16x32xf32>
    %cst_32 = arith.constant dense<0.000000e+00> : vector<16x128xf32>
    %31 = tpu.matmul %30, %25, %cst_32 {dimension_numbers = #tpu.dot_dimension_numbers<[1], [0], [0], [1], [0, 0, 1, 1], [], []>} : vector<16x32xf32>, vector<32x128xf32>, vector<16x128xf32> -> vector<16x128xf32>
    %32 = arith.maximumf %28, %31 : vector<16x128xf32>
    %c0_33 = arith.constant 0 : index
    %c0_34 = arith.constant 0 : index
    %c0_35 = arith.constant 0 : index
    %33 = vector.load %arg5[%c0_33, %c0_34, %c0_35] : memref<2x128x80xf32, #tpu.memory_space<vmem>>, vector<1x128x80xf32>
    %34 = vector.shape_cast %33 : vector<1x128x80xf32> to vector<128x80xf32>
    %cst_36 = arith.constant dense<0.000000e+00> : vector<16x80xf32>
    %35 = tpu.matmul %32, %34, %cst_36 {dimension_numbers = #tpu.dot_dimension_numbers<[1], [0], [0], [1], [0, 0, 1, 1], [], []>} : vector<16x128xf32>, vector<128x80xf32>, vector<16x80xf32> -> vector<16x80xf32>
    %c1_37 = arith.constant 1 : index
    %c0_38 = arith.constant 0 : index
    %c0_39 = arith.constant 0 : index
    %36 = vector.load %arg5[%c1_37, %c0_38, %c0_39] : memref<2x128x80xf32, #tpu.memory_space<vmem>>, vector<1x128x80xf32>
    %37 = vector.shape_cast %36 : vector<1x128x80xf32> to vector<128x80xf32>
    %cst_40 = arith.constant dense<0.000000e+00> : vector<16x80xf32>
    %38 = tpu.matmul %32, %37, %cst_40 {dimension_numbers = #tpu.dot_dimension_numbers<[1], [0], [0], [1], [0, 0, 1, 1], [], []>} : vector<16x128xf32>, vector<128x80xf32>, vector<16x80xf32> -> vector<16x80xf32>
    %39 = arith.maximumf %35, %38 : vector<16x80xf32>
    %c0_41 = arith.constant 0 : index
    %c0_42 = arith.constant 0 : index
    %c0_43 = arith.constant 0 : index
    %40 = vector.load %arg6[%c0_41, %c0_42, %c0_43] : memref<3x16x16xf32, #tpu.memory_space<vmem>>, vector<1x16x16xf32>
    %41 = vector.shape_cast %40 : vector<1x16x16xf32> to vector<16x16xf32>
    %cst_44 = arith.constant dense<0.000000e+00> : vector<16x80xf32>
    %42 = tpu.matmul %41, %39, %cst_44 {dimension_numbers = #tpu.dot_dimension_numbers<[1], [0], [0], [1], [0, 0, 1, 1], [], []>} : vector<16x16xf32>, vector<16x80xf32>, vector<16x80xf32> -> vector<16x80xf32>
    %c0_45 = arith.constant 0 : index
    %c0_46 = arith.constant 0 : index
    %c0_47 = arith.constant 0 : index
    %43 = vector.load %arg7[%c0_45, %c0_46, %c0_47] : memref<3x80x128xf32, #tpu.memory_space<vmem>>, vector<1x80x128xf32>
    %44 = vector.shape_cast %43 : vector<1x80x128xf32> to vector<80x128xf32>
    %cst_48 = arith.constant dense<0.000000e+00> : vector<16x128xf32>
    %45 = tpu.matmul %42, %44, %cst_48 {dimension_numbers = #tpu.dot_dimension_numbers<[1], [0], [0], [1], [0, 0, 1, 1], [], []>} : vector<16x80xf32>, vector<80x128xf32>, vector<16x128xf32> -> vector<16x128xf32>
    %c1_49 = arith.constant 1 : index
    %c0_50 = arith.constant 0 : index
    %c0_51 = arith.constant 0 : index
    %46 = vector.load %arg6[%c1_49, %c0_50, %c0_51] : memref<3x16x16xf32, #tpu.memory_space<vmem>>, vector<1x16x16xf32>
    %47 = vector.shape_cast %46 : vector<1x16x16xf32> to vector<16x16xf32>
    %cst_52 = arith.constant dense<0.000000e+00> : vector<16x80xf32>
    %48 = tpu.matmul %47, %39, %cst_52 {dimension_numbers = #tpu.dot_dimension_numbers<[1], [0], [0], [1], [0, 0, 1, 1], [], []>} : vector<16x16xf32>, vector<16x80xf32>, vector<16x80xf32> -> vector<16x80xf32>
    %c1_53 = arith.constant 1 : index
    %c0_54 = arith.constant 0 : index
    %c0_55 = arith.constant 0 : index
    %49 = vector.load %arg7[%c1_53, %c0_54, %c0_55] : memref<3x80x128xf32, #tpu.memory_space<vmem>>, vector<1x80x128xf32>
    %50 = vector.shape_cast %49 : vector<1x80x128xf32> to vector<80x128xf32>
    %cst_56 = arith.constant dense<0.000000e+00> : vector<16x128xf32>
    %51 = tpu.matmul %48, %50, %cst_56 {dimension_numbers = #tpu.dot_dimension_numbers<[1], [0], [0], [1], [0, 0, 1, 1], [], []>} : vector<16x80xf32>, vector<80x128xf32>, vector<16x128xf32> -> vector<16x128xf32>
    %52 = arith.addf %45, %51 : vector<16x128xf32>
    %c2_57 = arith.constant 2 : index
    %c0_58 = arith.constant 0 : index
    %c0_59 = arith.constant 0 : index
    %53 = vector.load %arg6[%c2_57, %c0_58, %c0_59] : memref<3x16x16xf32, #tpu.memory_space<vmem>>, vector<1x16x16xf32>
    %54 = vector.shape_cast %53 : vector<1x16x16xf32> to vector<16x16xf32>
    %cst_60 = arith.constant dense<0.000000e+00> : vector<16x80xf32>
    %55 = tpu.matmul %54, %39, %cst_60 {dimension_numbers = #tpu.dot_dimension_numbers<[1], [0], [0], [1], [0, 0, 1, 1], [], []>} : vector<16x16xf32>, vector<16x80xf32>, vector<16x80xf32> -> vector<16x80xf32>
    %c2_61 = arith.constant 2 : index
    %c0_62 = arith.constant 0 : index
    %c0_63 = arith.constant 0 : index
    %56 = vector.load %arg7[%c2_61, %c0_62, %c0_63] : memref<3x80x128xf32, #tpu.memory_space<vmem>>, vector<1x80x128xf32>
    %57 = vector.shape_cast %56 : vector<1x80x128xf32> to vector<80x128xf32>
    %cst_64 = arith.constant dense<0.000000e+00> : vector<16x128xf32>
    %58 = tpu.matmul %55, %57, %cst_64 {dimension_numbers = #tpu.dot_dimension_numbers<[1], [0], [0], [1], [0, 0, 1, 1], [], []>} : vector<16x80xf32>, vector<80x128xf32>, vector<16x128xf32> -> vector<16x128xf32>
    %59 = arith.addf %52, %58 : vector<16x128xf32>
    %c0_65 = arith.constant 0 : index
    %c0_66 = arith.constant 0 : index
    %60 = vector.load %arg8[%c0_65, %c0_66] : memref<1x128xf32, #tpu.memory_space<vmem>>, vector<1x128xf32>
    %61 = vector.broadcast %60 : vector<1x128xf32> to vector<16x128xf32>
    %62 = arith.addf %59, %61 : vector<16x128xf32>
    %cst_67 = arith.constant 0.000000e+00 : f32
    %63 = vector.broadcast %cst_67 : f32 to vector<16x128xf32>
    %64 = arith.maximumf %62, %63 : vector<16x128xf32>
    %c0_68 = arith.constant 0 : index
    %c0_69 = arith.constant 0 : index
    %c0_70 = arith.constant 0 : index
    %65 = vector.load %arg9[%c0_68, %c0_69, %c0_70] : memref<2x8x16xf32, #tpu.memory_space<vmem>>, vector<1x8x16xf32>
    %66 = vector.shape_cast %65 : vector<1x8x16xf32> to vector<8x16xf32>
    %cst_71 = arith.constant dense<0.000000e+00> : vector<8x128xf32>
    %67 = tpu.matmul %66, %64, %cst_71 {dimension_numbers = #tpu.dot_dimension_numbers<[1], [0], [0], [1], [0, 0, 1, 1], [], []>} : vector<8x16xf32>, vector<16x128xf32>, vector<8x128xf32> -> vector<8x128xf32>
    %c1_72 = arith.constant 1 : index
    %c0_73 = arith.constant 0 : index
    %c0_74 = arith.constant 0 : index
    %68 = vector.load %arg9[%c1_72, %c0_73, %c0_74] : memref<2x8x16xf32, #tpu.memory_space<vmem>>, vector<1x8x16xf32>
    %69 = vector.shape_cast %68 : vector<1x8x16xf32> to vector<8x16xf32>
    %cst_75 = arith.constant dense<0.000000e+00> : vector<8x128xf32>
    %70 = tpu.matmul %69, %64, %cst_75 {dimension_numbers = #tpu.dot_dimension_numbers<[1], [0], [0], [1], [0, 0, 1, 1], [], []>} : vector<8x16xf32>, vector<16x128xf32>, vector<8x128xf32> -> vector<8x128xf32>
    %71 = arith.maximumf %67, %70 : vector<8x128xf32>
    %c0_76 = arith.constant 0 : index
    %c0_77 = arith.constant 0 : index
    %c0_78 = arith.constant 0 : index
    %72 = vector.load %arg10[%c0_76, %c0_77, %c0_78] : memref<2x128x64xf32, #tpu.memory_space<vmem>>, vector<1x128x64xf32>
    %73 = vector.shape_cast %72 : vector<1x128x64xf32> to vector<128x64xf32>
    %cst_79 = arith.constant dense<0.000000e+00> : vector<8x64xf32>
    %74 = tpu.matmul %71, %73, %cst_79 {dimension_numbers = #tpu.dot_dimension_numbers<[1], [0], [0], [1], [0, 0, 1, 1], [], []>} : vector<8x128xf32>, vector<128x64xf32>, vector<8x64xf32> -> vector<8x64xf32>
    %c1_80 = arith.constant 1 : index
    %c0_81 = arith.constant 0 : index
    %c0_82 = arith.constant 0 : index
    %75 = vector.load %arg10[%c1_80, %c0_81, %c0_82] : memref<2x128x64xf32, #tpu.memory_space<vmem>>, vector<1x128x64xf32>
    %76 = vector.shape_cast %75 : vector<1x128x64xf32> to vector<128x64xf32>
    %cst_83 = arith.constant dense<0.000000e+00> : vector<8x64xf32>
    %77 = tpu.matmul %71, %76, %cst_83 {dimension_numbers = #tpu.dot_dimension_numbers<[1], [0], [0], [1], [0, 0, 1, 1], [], []>} : vector<8x128xf32>, vector<128x64xf32>, vector<8x64xf32> -> vector<8x64xf32>
    %78 = arith.maximumf %74, %77 : vector<8x64xf32>
    %c0_84 = arith.constant 0 : index
    %c0_85 = arith.constant 0 : index
    %c0_86 = arith.constant 0 : index
    %79 = vector.load %arg11[%c0_84, %c0_85, %c0_86] : memref<4x2x8xf32, #tpu.memory_space<vmem>>, vector<1x2x8xf32>
    %80 = vector.shape_cast %79 : vector<1x2x8xf32> to vector<2x8xf32>
    %cst_87 = arith.constant dense<0.000000e+00> : vector<2x64xf32>
    %81 = tpu.matmul %80, %78, %cst_87 {dimension_numbers = #tpu.dot_dimension_numbers<[1], [0], [0], [1], [0, 0, 1, 1], [], []>} : vector<2x8xf32>, vector<8x64xf32>, vector<2x64xf32> -> vector<2x64xf32>
    %c0_88 = arith.constant 0 : index
    %c0_89 = arith.constant 0 : index
    %c0_90 = arith.constant 0 : index
    %82 = vector.load %arg12[%c0_88, %c0_89, %c0_90] : memref<4x64x32xf32, #tpu.memory_space<vmem>>, vector<1x64x32xf32>
    %83 = vector.shape_cast %82 : vector<1x64x32xf32> to vector<64x32xf32>
    %cst_91 = arith.constant dense<0.000000e+00> : vector<2x32xf32>
    %84 = tpu.matmul %81, %83, %cst_91 {dimension_numbers = #tpu.dot_dimension_numbers<[1], [0], [0], [1], [0, 0, 1, 1], [], []>} : vector<2x64xf32>, vector<64x32xf32>, vector<2x32xf32> -> vector<2x32xf32>
    %c1_92 = arith.constant 1 : index
    %c0_93 = arith.constant 0 : index
    %c0_94 = arith.constant 0 : index
    %85 = vector.load %arg11[%c1_92, %c0_93, %c0_94] : memref<4x2x8xf32, #tpu.memory_space<vmem>>, vector<1x2x8xf32>
    %86 = vector.shape_cast %85 : vector<1x2x8xf32> to vector<2x8xf32>
    %cst_95 = arith.constant dense<0.000000e+00> : vector<2x64xf32>
    %87 = tpu.matmul %86, %78, %cst_95 {dimension_numbers = #tpu.dot_dimension_numbers<[1], [0], [0], [1], [0, 0, 1, 1], [], []>} : vector<2x8xf32>, vector<8x64xf32>, vector<2x64xf32> -> vector<2x64xf32>
    %c1_96 = arith.constant 1 : index
    %c0_97 = arith.constant 0 : index
    %c0_98 = arith.constant 0 : index
    %88 = vector.load %arg12[%c1_96, %c0_97, %c0_98] : memref<4x64x32xf32, #tpu.memory_space<vmem>>, vector<1x64x32xf32>
    %89 = vector.shape_cast %88 : vector<1x64x32xf32> to vector<64x32xf32>
    %cst_99 = arith.constant dense<0.000000e+00> : vector<2x32xf32>
    %90 = tpu.matmul %87, %89, %cst_99 {dimension_numbers = #tpu.dot_dimension_numbers<[1], [0], [0], [1], [0, 0, 1, 1], [], []>} : vector<2x64xf32>, vector<64x32xf32>, vector<2x32xf32> -> vector<2x32xf32>
    %91 = arith.addf %84, %90 : vector<2x32xf32>
    %c2_100 = arith.constant 2 : index
    %c0_101 = arith.constant 0 : index
    %c0_102 = arith.constant 0 : index
    %92 = vector.load %arg11[%c2_100, %c0_101, %c0_102] : memref<4x2x8xf32, #tpu.memory_space<vmem>>, vector<1x2x8xf32>
    %93 = vector.shape_cast %92 : vector<1x2x8xf32> to vector<2x8xf32>
    %cst_103 = arith.constant dense<0.000000e+00> : vector<2x64xf32>
    %94 = tpu.matmul %93, %78, %cst_103 {dimension_numbers = #tpu.dot_dimension_numbers<[1], [0], [0], [1], [0, 0, 1, 1], [], []>} : vector<2x8xf32>, vector<8x64xf32>, vector<2x64xf32> -> vector<2x64xf32>
    %c2_104 = arith.constant 2 : index
    %c0_105 = arith.constant 0 : index
    %c0_106 = arith.constant 0 : index
    %95 = vector.load %arg12[%c2_104, %c0_105, %c0_106] : memref<4x64x32xf32, #tpu.memory_space<vmem>>, vector<1x64x32xf32>
    %96 = vector.shape_cast %95 : vector<1x64x32xf32> to vector<64x32xf32>
    %cst_107 = arith.constant dense<0.000000e+00> : vector<2x32xf32>
    %97 = tpu.matmul %94, %96, %cst_107 {dimension_numbers = #tpu.dot_dimension_numbers<[1], [0], [0], [1], [0, 0, 1, 1], [], []>} : vector<2x64xf32>, vector<64x32xf32>, vector<2x32xf32> -> vector<2x32xf32>
    %98 = arith.addf %91, %97 : vector<2x32xf32>
    %c3 = arith.constant 3 : index
    %c0_108 = arith.constant 0 : index
    %c0_109 = arith.constant 0 : index
    %99 = vector.load %arg11[%c3, %c0_108, %c0_109] : memref<4x2x8xf32, #tpu.memory_space<vmem>>, vector<1x2x8xf32>
    %100 = vector.shape_cast %99 : vector<1x2x8xf32> to vector<2x8xf32>
    %cst_110 = arith.constant dense<0.000000e+00> : vector<2x64xf32>
    %101 = tpu.matmul %100, %78, %cst_110 {dimension_numbers = #tpu.dot_dimension_numbers<[1], [0], [0], [1], [0, 0, 1, 1], [], []>} : vector<2x8xf32>, vector<8x64xf32>, vector<2x64xf32> -> vector<2x64xf32>
    %c3_111 = arith.constant 3 : index
    %c0_112 = arith.constant 0 : index
    %c0_113 = arith.constant 0 : index
    %102 = vector.load %arg12[%c3_111, %c0_112, %c0_113] : memref<4x64x32xf32, #tpu.memory_space<vmem>>, vector<1x64x32xf32>
    %103 = vector.shape_cast %102 : vector<1x64x32xf32> to vector<64x32xf32>
    %cst_114 = arith.constant dense<0.000000e+00> : vector<2x32xf32>
    %104 = tpu.matmul %101, %103, %cst_114 {dimension_numbers = #tpu.dot_dimension_numbers<[1], [0], [0], [1], [0, 0, 1, 1], [], []>} : vector<2x64xf32>, vector<64x32xf32>, vector<2x32xf32> -> vector<2x32xf32>
    %105 = arith.addf %98, %104 : vector<2x32xf32>
    %c0_115 = arith.constant 0 : index
    %c0_116 = arith.constant 0 : index
    %106 = vector.load %arg13[%c0_115, %c0_116] : memref<1x32xf32, #tpu.memory_space<vmem>>, vector<1x32xf32>
    %107 = vector.broadcast %106 : vector<1x32xf32> to vector<2x32xf32>
    %108 = arith.addf %105, %107 : vector<2x32xf32>
    %cst_117 = arith.constant 0.000000e+00 : f32
    %109 = vector.broadcast %cst_117 : f32 to vector<2x32xf32>
    %110 = arith.maximumf %108, %109 : vector<2x32xf32>
    %c0_118 = arith.constant 0 : index
    %c0_119 = arith.constant 0 : index
    %111 = vector.load %arg14[%c0_118, %c0_119] : memref<32x10xf32, #tpu.memory_space<vmem>>, vector<32x10xf32>
    %cst_120 = arith.constant dense<0.000000e+00> : vector<2x10xf32>
    %112 = tpu.matmul %110, %111, %cst_120 {dimension_numbers = #tpu.dot_dimension_numbers<[1], [0], [0], [1], [0, 0, 1, 1], [], []>} : vector<2x32xf32>, vector<32x10xf32>, vector<2x10xf32> -> vector<2x10xf32>
    %c0_121 = arith.constant 0 : index
    %c0_122 = arith.constant 0 : index
    %113 = vector.load %arg15[%c0_121, %c0_122] : memref<1x10xf32, #tpu.memory_space<vmem>>, vector<1x10xf32>
    %114 = vector.broadcast %113 : vector<1x10xf32> to vector<2x10xf32>
    %115 = arith.addf %112, %114 : vector<2x10xf32>
    %c0_123 = arith.constant 0 : index
    %c0_124 = arith.constant 0 : index
    %116 = vector.load %arg16[%c0_123, %c0_124] : memref<2x10xf32, #tpu.memory_space<vmem>>, vector<2x10xf32>
    tpu.vector_store %arg16[%c0_123, %c0_124], %115 {strides = array<i32>} : memref<2x10xf32, #tpu.memory_space<vmem>>, vector<2x10xf32>,
    return
  }
}

</mosaic_0001>

<bundles_post_ra>
// kernel: cnn_forward.1
= control target key start
LH: loop header
LB: loop body
LE: loop exit
PB: predicated region body
PF: predicated region fallthrough
CT: control target
= control target key end

     0   :  { %s4466_s0 = inlined_call_operand.vmem [shape: f32[32,72], index: 0, kind: input, shape index: {}]   ;;  %s4467_s1 = inlined_call_operand.vmem [shape: f32[3,32,32], index: 1, kind: input, shape index: {}]   ;;  %s4468_s2 = inlined_call_operand.vmem [shape: f32[3,72,128], index: 2, kind: input, shape index: {}]   ;;  %s4469_s3 = inlined_call_operand.vmem [shape: f32[1,128], index: 3, kind: input, shape index: {}]   ;;  %s4470_s4 = inlined_call_operand.vmem [shape: f32[2,16,32], index: 4, kind: input, shape index: {}]   ;;  %s4471_s5 = inlined_call_operand.vmem [shape: f32[2,128,80], index: 5, kind: input, shape index: {}]   ;;  %s4472_s6 = inlined_call_operand.vmem [shape: f32[3,16,16], index: 6, kind: input, shape index: {}]   ;;  %s4473_s7 = inlined_call_operand.vmem [shape: f32[3,80,128], index: 7, kind: input, shape index: {}]   ;;  %s4474_s8 = inlined_call_operand.vmem [shape: f32[1,128], index: 8, kind: input, shape index: {}]   ;;  %s4475_s9 = inlined_call_operand.vmem [shape: f32[2,8,16], index: 9, kind: input, shape index: {}]   ;;  %s4476_s10 = inlined_call_operand.vmem [shape: f32[2,128,64], index: 10, kind: input, shape index: {}]   ;;  %s4477_s11 = inlined_call_operand.vmem [shape: f32[4,2,8], index: 11, kind: input, shape index: {}]   ;;  %s4478_s12 = inlined_call_operand.vmem [shape: f32[4,64,32], index: 12, kind: input, shape index: {}]   ;;  %s4479_s13 = inlined_call_operand.vmem [shape: f32[1,32], index: 13, kind: input, shape index: {}]   ;;  %s4480_s14 = inlined_call_operand.vmem [shape: f32[32,10], index: 14, kind: input, shape index: {}]   ;;  %s4481_s15 = inlined_call_operand.vmem [shape: f32[1,10], index: 15, kind: input, shape index: {}]   ;;  %s4482_s16 = inlined_call_operand.hbm [shape: f32[2,10], index: 16, kind: output, shape index: {}]  }
   0x1   :  { %4484 = sst [smem:[#allocation5_spill]] %s4466_s0 }
   0x2   :  { %s4485_s23 = sld [smem:[#allocation5_spill]]  ;;  %v58_v4 = vld [vmem:[%s4467_s1] sm:$0xff]  ;;  %vm62_vm0 = vcmask 261120   ;;  %v59_v6 = vld [vmem:[%s4467_s1 + $0x8] sm:$0xff]  ;;  %v60_v8 = vld [vmem:[%s4467_s1 + $0x10] sm:$0xff] }
   0x3   :  { %v2666_v5 = vld [vmem:[%s4467_s1 + $0x20] sm:$0xff]  ;;  %v2667_v7 = vld [vmem:[%s4467_s1 + $0x28] sm:$0xff]  ;;  %3085 = vmatprep.mubr.msk.f32.mxu0 %vm62_vm0, %v58_v4  ;;  %v2668_v9 = vld [vmem:[%s4467_s1 + $0x30] sm:$0xff] }
   0x8   :  { %v3680_v0 = vld [vmem:[%s4485_s23 + $0x18] sm:$0xff]  ;;  %v3685_v1 = vld [vmem:[%s4485_s23 + $0x10] sm:$0xff]  ;;  %v3694_v2 = vld [vmem:[%s4485_s23 + $0x8] sm:$0xff] }
   0x9   :  { %3077 = vmatprep.subr.mxu0 %v3680_v0  ;;  %3091 = vmatprep.subr.mxu1 %v3680_v0  ;;  %v3703_v3 = vld [vmem:[%s4485_s23] sm:$0xff] }
   0xa   :  { %3078 = vmatpush3.msra.mxu0 %v3680_v0  ;;  %3092 = vmatpush3.msra.mxu1 %v3680_v0 }
   0xb   :  { %3079 = vmatprep.subr.mxu0 %v3685_v1  ;;  %3093 = vmatprep.subr.mxu1 %v3685_v1 }
   0xc   :  { %3080 = vmatpush3.msra.mxu0 %v3685_v1  ;;  %3094 = vmatpush3.msra.mxu1 %v3685_v1 }
   0xd   :  { %3081 = vmatprep.subr.mxu0 %v3694_v2  ;;  %3095 = vmatprep.subr.mxu1 %v3694_v2 }
   0xe   :  { %3082 = vmatpush3.msra.mxu0 %v3694_v2  ;;  %3096 = vmatpush3.msra.mxu1 %v3694_v2 }
   0xf   :  { %3083 = vmatprep.subr.mxu0 %v3703_v3  ;;  %3097 = vmatprep.subr.mxu1 %v3703_v3 }
  0x10   :  { %3084 = vmatpush3.msra.mxu0 %v3703_v3 }
  0x11   :  { %21 = vsyncpa [#allocation3], 0  ;;  %3098 = vmatpush3.msra.mxu1 %v3703_v3  ;;  %3099 = vmatprep.mubr.msk.f32.mxu1 %vm62_vm0, %v2666_v5  ;;  %v2682_v10 = vld [vmem:[%s4468_s2 + $0x88] sm:$0xff]  ;;  %v168_v11 = vld [vmem:[%s4468_s2 + $0x40] sm:$0xff]  ;;  %vm281_vm1 = vcmask 588800   ;;  %vm1060_vm2 = vcmask 130048  }
  0x12   :  { %3086 = vmatmul.mubr.msk.f32.vlgmr.msra.gmra.mxu0 %vm62_vm0, %v59_v6  ;;  %3100 = vmatmul.mubr.msk.f32.vlgmr.msra.gmra.mxu1 %vm62_vm0, %v2667_v7  ;;  %v61_v12 = vld [vmem:[%s4467_s1 + $0x18] sm:$0xff]  ;;  %v2681_v14 = vld [vmem:[%s4468_s2 + $0x80] sm:$0xff]  ;;  %v166_v17 = vld [vmem:[%s4468_s2 + $0x30] sm:$0xff]  ;;  %vm1247_vm3 = vcmask 654336   ;;  %vm3590_vm4 = vmmov 0   ;;  %vm1924_vm5 = vcmask 64512  }
  0x13   :  { %3088 = vmatprep.mubr.msk.f32.mxu0 %vm62_vm0, %v60_v8  ;;  %3102 = vmatprep.mubr.msk.f32.mxu1 %vm62_vm0, %v2668_v9  ;;  %v2669_v13 = vld [vmem:[%s4467_s1 + $0x38] sm:$0xff]  ;;  %v2679_v18 = vld [vmem:[%s4468_s2 + $0x70] sm:$0xff]  ;;  %v165_v19 = vld [vmem:[%s4468_s2 + $0x28] sm:$0xff]  ;;  %vm2090_vm6 = vcmask 523264   ;;  %vm2646_vm7 = vcmask 74752  }
  0x14   :  { %3105 = vmatprep.subr.mxu0 %v2682_v10  ;;  %3129 = vmatprep.subr.mxu1 %v168_v11  ;;  %v167_v15 = vld [vmem:[%s4468_s2 + $0x38] sm:$0xff]  ;;  %v2678_v20 = vld [vmem:[%s4468_s2 + $0x68] sm:$0xff]  ;;  %v164_v21 = vld [vmem:[%s4468_s2 + $0x20] sm:$0xff] }
  0x15   :  { %3106 = vmatpush3.msra.mxu0 %v2682_v10  ;;  %3130 = vmatpush3.msra.mxu1 %v168_v11  ;;  %v2680_v16 = vld [vmem:[%s4468_s2 + $0x78] sm:$0xff]  ;;  %v2677_v22 = vld [vmem:[%s4468_s2 + $0x60] sm:$0xff]  ;;  %v162_v25 = vld [vmem:[%s4468_s2 + $0x10] sm:$0xff] }
  0x16   :  { %3089 = vmatmul.mubr.msk.f32.gmra.mxu0 %vm62_vm0, %v61_v12  ;;  %3103 = vmatmul.mubr.msk.f32.gmra.mxu1 %vm62_vm0, %v2669_v13  ;;  %v163_v23 = vld [vmem:[%s4468_s2 + $0x18] sm:$0xff]  ;;  %v2675_v26 = vld [vmem:[%s4468_s2 + $0x50] sm:$0xff]  ;;  %v161_v27 = vld [vmem:[%s4468_s2 + $0x8] sm:$0xff] }
  0x17   :  { %3107 = vmatprep.subr.mxu0 %v2681_v14  ;;  %3131 = vmatprep.subr.mxu1 %v167_v15  ;;  %v2676_v24 = vld [vmem:[%s4468_s2 + $0x58] sm:$0xff]  ;;  %v2674_v28 = vld [vmem:[%s4468_s2 + $0x48] sm:$0xff]  ;;  %v160_v29 = vld [vmem:[%s4468_s2] sm:$0xff] }
  0x18   :  { %3108 = vmatpush3.msra.mxu0 %v2681_v14  ;;  %3132 = vmatpush3.msra.mxu1 %v167_v15  ;;  %v2707_v30 = vld [vmem:[%s4468_s2 + $0xd0] sm:$0xff]  ;;  %v2706_v35 = vld [vmem:[%s4468_s2 + $0xc8] sm:$0xff]  ;;  %v2691_v40 = vld [vmem:[%s4467_s1 + $0x40] sm:$0xff] }
  0x19   :  { %3109 = vmatprep.subr.mxu0 %v2680_v16  ;;  %3133 = vmatprep.subr.mxu1 %v166_v17  ;;  %v2705_v41 = vld [vmem:[%s4468_s2 + $0xc0] sm:$0xff]  ;;  %v2692_v42 = vld [vmem:[%s4467_s1 + $0x48] sm:$0xff]  ;;  %v2693_v43 = vld [vmem:[%s4467_s1 + $0x50] sm:$0xff] }
  0x1a   :  { %3110 = vmatpush3.msra.mxu0 %v2680_v16  ;;  %3134 = vmatpush3.msra.mxu1 %v166_v17  ;;  %v2694_v44 = vld [vmem:[%s4467_s1 + $0x58] sm:$0xff]  ;;  %v2703_v46 = vld [vmem:[%s4468_s2 + $0xb0] sm:$0xff]  ;;  %v2702_v47 = vld [vmem:[%s4468_s2 + $0xa8] sm:$0xff] }
  0x1b   :  { %3111 = vmatprep.subr.mxu0 %v2679_v18  ;;  %3135 = vmatprep.subr.mxu1 %v165_v19  ;;  %v2704_v45 = vld [vmem:[%s4468_s2 + $0xb8] sm:$0xff]  ;;  %v2701_v48 = vld [vmem:[%s4468_s2 + $0xa0] sm:$0xff]  ;;  %v2699_v50 = vld [vmem:[%s4468_s2 + $0x90] sm:$0xff] }
  0x1c   :  { %3112 = vmatpush3.msra.mxu0 %v2679_v18  ;;  %3136 = vmatpush3.msra.mxu1 %v165_v19  ;;  %v2700_v49 = vld [vmem:[%s4468_s2 + $0x98] sm:$0xff]  ;;  %v704_v59 = vld [vmem:[%s4470_s4] sm:$0xff]  ;;  %v887_v61 = vld [vmem:[%s4471_s5 + $0x70] sm:$0xff] }
  0x1d   :  { %3113 = vmatprep.subr.mxu0 %v2678_v20  ;;  %3137 = vmatprep.subr.mxu1 %v164_v21  ;;  %v888_v60 = vld [vmem:[%s4471_s5 + $0x78] sm:$0xff]  ;;  %v886_v62 = vld [vmem:[%s4471_s5 + $0x68] sm:$0xff]  ;;  %v885_v63 = vld [vmem:[%s4471_s5 + $0x60] sm:$0xff] }
  0x1e   :  { %3114 = vmatpush3.msra.mxu0 %v2678_v20  ;;  %3138 = vmatpush3.msra.mxu1 %v164_v21  ;;  %v880_v4 = vld [vmem:[%s4471_s5 + $0x38] sm:$0xff]  ;;  %v2712_v18 = vld [vmem:[%s4469_s3] ss:$0 sm:$0xff] }
  0x1f   :  { %3115 = vmatprep.subr.mxu0 %v2677_v22  ;;  %3139 = vmatprep.subr.mxu1 %v163_v23 }
  0x20   :  { %3116 = vmatpush3.msra.mxu0 %v2677_v22  ;;  %3140 = vmatpush3.msra.mxu1 %v163_v23 }
  0x21   :  { %3117 = vmatprep.subr.mxu0 %v2676_v24  ;;  %3141 = vmatprep.subr.mxu1 %v162_v25 }
  0x22   :  { %3118 = vmatpush3.msra.mxu0 %v2676_v24  ;;  %3142 = vmatpush3.msra.mxu1 %v162_v25 }
  0x23   :  { %3119 = vmatprep.subr.mxu0 %v2675_v26  ;;  %3143 = vmatprep.subr.mxu1 %v161_v27 }
  0x24   :  { %3120 = vmatpush3.msra.mxu0 %v2675_v26  ;;  %3144 = vmatpush3.msra.mxu1 %v161_v27 }
  0x25   :  { %3121 = vmatprep.subr.mxu0 %v2674_v28  ;;  %3145 = vmatprep.subr.mxu1 %v160_v29 }
  0x26   :  { %3122 = vmatpush3.msra.mxu0 %v2674_v28  ;;  %3146 = vmatpush3.msra.mxu1 %v160_v29 }
  0x27   :  { %3153 = vmatprep.subr.mxu0 %v3680_v0  ;;  %3167 = vmatprep.subr.mxu1 %v2707_v30 }
  0xd2   :  { %v3087_v31 = vpop.f32.mrf.mxu0  ;;  %v3101_v32 = vpop.f32.mrf.mxu1 }
  0xd4   :  { %v141_v33 = vpop.f32.mrf.mxu0  ;;  %v252_v34 = vpop.f32.mrf.mxu1 }
  0xd5   :  { %3123 = vmatprep.mubr.msk.f32.mxu0 %vm281_vm1, %v252_v34  ;;  %3147 = vmatprep.mubr.msk.f32.mxu1 %vm281_vm1, %v141_v33  ;;  %v2734_v33 = vld [vmem:[%s4471_s5 + $0xf8] sm:$0xff]  ;;  %v2733_v34 = vld [vmem:[%s4471_s5 + $0xf0] sm:$0xff] }
  0xd6   :  { %v3090_v36 = vpop.f32.mrf.mxu0  ;;  %v3104_v37 = vpop.f32.mrf.mxu1  ;;  %3124 = vmatmul.mubr.msk.f32.vlgmr.msra.gmra.mxu0 %vm281_vm1, %v3101_v32  ;;  %3148 = vmatmul.mubr.msk.f32.vlgmr.msra.gmra.mxu1 %vm281_vm1, %v3087_v31  ;;  %v2715_v31 = vld [vmem:[%s4470_s4 + $0x10] sm:$0xff]  ;;  %v2716_v32 = vld [vmem:[%s4470_s4 + $0x18] sm:$0xff] }
  0xd7   :  { %3154 = vmatpush3.msra.mxu0 %v3680_v0  ;;  %3168 = vmatpush3.msra.mxu1 %v2707_v30  ;;  %v884_v0 = vld [vmem:[%s4471_s5 + $0x58] sm:$0xff]  ;;  %v705_v30 = vld [vmem:[%s4470_s4 + $0x8] sm:$0xff] }
  0xd8   :  { %v151_v38 = vpop.f32.mrf.mxu0  ;;  %v262_v39 = vpop.f32.mrf.mxu1  ;;  %3155 = vmatprep.subr.mxu0 %v3685_v1  ;;  %3169 = vmatprep.subr.mxu1 %v2706_v35 }
  0xd9   :  { %3126 = vmatprep.mubr.msk.f32.mxu0 %vm281_vm1, %v262_v39  ;;  %3150 = vmatprep.mubr.msk.f32.mxu1 %vm281_vm1, %v151_v38  ;;  %v2729_v38 = vld [vmem:[%s4471_s5 + $0xd0] sm:$0xff]  ;;  %v2728_v39 = vld [vmem:[%s4471_s5 + $0xc8] sm:$0xff] }
  0xda   :  { %3156 = vmatpush3.msra.mxu0 %v3685_v1  ;;  %3151 = vmatmul.mubr.msk.f32.gmra.mxu1 %vm281_vm1, %v3090_v36  ;;  %v883_v1 = vld [vmem:[%s4471_s5 + $0x50] sm:$0xff]  ;;  %v2731_v36 = vld [vmem:[%s4471_s5 + $0xe0] sm:$0xff] }
  0xdb   :  { %3127 = vmatmul.mubr.msk.f32.gmra.mxu0 %vm281_vm1, %v3104_v37  ;;  %3157 = vmatprep.subr.mxu0 %v3694_v2  ;;  %v2730_v37 = vld [vmem:[%s4471_s5 + $0xd8] sm:$0xff] }
  0xdc   :  { %3158 = vmatpush3.msra.mxu0 %v3694_v2  ;;  %3161 = vmatprep.mubr.msk.f32.mxu0 %vm62_vm0, %v2691_v40  ;;  %v882_v2 = vld [vmem:[%s4471_s5 + $0x48] sm:$0xff]  ;;  %v2727_v40 = vld [vmem:[%s4471_s5 + $0xc0] sm:$0xff] }
  0xdd   :  { %3159 = vmatprep.subr.mxu0 %v3703_v3  ;;  %3170 = vmatpush3.msra.mxu1 %v2706_v35  ;;  %v2732_v35 = vld [vmem:[%s4471_s5 + $0xe8] sm:$0xff] }
  0xde   :  { %3160 = vmatpush3.msra.mxu0 %v3703_v3  ;;  %3171 = vmatprep.subr.mxu1 %v2705_v41  ;;  %v881_v3 = vld [vmem:[%s4471_s5 + $0x40] sm:$0xff] }
  0xdf   :  { %3162 = vmatmul.mubr.msk.f32.vlgmr.msra.gmra.mxu0 %vm62_vm0, %v2692_v42  ;;  %3172 = vmatpush3.msra.mxu1 %v2705_v41  ;;  %v2726_v41 = vld [vmem:[%s4471_s5 + $0xb8] sm:$0xff]  ;;  %v879_v42 = vld [vmem:[%s4471_s5 + $0x30] sm:$0xff] }
  0xe0   :  { %3164 = vmatprep.mubr.msk.f32.mxu0 %vm62_vm0, %v2693_v43  ;;  %3173 = vmatprep.subr.mxu1 %v2704_v45  ;;  %v2725_v43 = vld [vmem:[%s4471_s5 + $0xb0] sm:$0xff] }
  0xe1   :  { %3174 = vmatpush3.msra.mxu1 %v2704_v45  ;;  %v2724_v45 = vld [vmem:[%s4471_s5 + $0xa8] sm:$0xff] }
  0xe2   :  { %3175 = vmatprep.subr.mxu1 %v2703_v46 }
  0xe3   :  { %3165 = vmatmul.mubr.msk.f32.gmra.mxu0 %vm62_vm0, %v2694_v44  ;;  %3176 = vmatpush3.msra.mxu1 %v2703_v46  ;;  %v878_v44 = vld [vmem:[%s4471_s5 + $0x28] sm:$0xff]  ;;  %v877_v46 = vld [vmem:[%s4471_s5 + $0x20] sm:$0xff] }
  0xe4   :  { %3177 = vmatprep.subr.mxu1 %v2702_v47  ;;  %3199 = vmatprep.mubr.msk.f32.mxu0 %vm62_vm0, %v704_v59 }
  0xe5   :  { %3178 = vmatpush3.msra.mxu1 %v2702_v47  ;;  %v2723_v47 = vld [vmem:[%s4471_s5 + $0xa0] sm:$0xff] }
  0xe6   :  { %3179 = vmatprep.subr.mxu1 %v2701_v48 }
  0xe7   :  { %3180 = vmatpush3.msra.mxu1 %v2701_v48  ;;  %v876_v48 = vld [vmem:[%s4471_s5 + $0x18] sm:$0xff] }
  0xe8   :  { %3181 = vmatprep.subr.mxu1 %v2700_v49 }
  0xe9   :  { %3182 = vmatpush3.msra.mxu1 %v2700_v49  ;;  %v2722_v49 = vld [vmem:[%s4471_s5 + $0x98] sm:$0xff] }
  0xea   :  { %3183 = vmatprep.subr.mxu1 %v2699_v50 }
  0xeb   :  { %3184 = vmatpush3.msra.mxu1 %v2699_v50  ;;  %v875_v50 = vld [vmem:[%s4471_s5 + $0x10] sm:$0xff] }
  0xec   :  { %3213 = vmatprep.subr.mxu1 %v888_v60 }
 0x196   :  { %v3125_v51 = vpop.f32.mrf.mxu0  ;;  %v3149_v5 = vpop.f32.mrf.mxu1 }
 0x197   :  { %v463_v11 = vadd.f32 %v3149_v5, %v3125_v51  ;;  %v2721_v51 = vld [vmem:[%s4471_s5 + $0x90] sm:$0xff]  ;;  %v2743_v5 = vld [vmem:[%s4473_s7 + $0x60] sm:$0xff] }
 0x198   :  { %v360_v52 = vpop.f32.mrf.mxu0  ;;  %v457_v6 = vpop.f32.mrf.mxu1 }
 0x199   :  { %v458_v14 = vadd.f32 %v457_v6, %v360_v52  ;;  %v874_v52 = vld [vmem:[%s4471_s5 + $0x8] sm:$0xff]  ;;  %v2742_v6 = vld [vmem:[%s4473_s7 + $0x58] sm:$0xff] }
 0x19a   :  { %v3152_v7 = vpop.f32.mrf.mxu1 }
 0x19b   :  { %v3128_v53 = vpop.f32.mrf.mxu0 }
 0x19c   :  { %v467_v8 = vpop.f32.mrf.mxu1  ;;  %v473_v12 = vadd.f32 %v3152_v7, %v3128_v53  ;;  %v2720_v53 = vld [vmem:[%s4471_s5 + $0x88] sm:$0xff]  ;;  %v2741_v7 = vld [vmem:[%s4473_s7 + $0x50] sm:$0xff] }
 0x19d   :  { %v370_v54 = vpop.f32.mrf.mxu0 }
 0x19e   :  { %v468_v15 = vadd.f32 %v467_v8, %v370_v54  ;;  %v873_v54 = vld [vmem:[%s4471_s5] sm:$0xff] }
 0x19f   :  { %v3163_v55 = vpop.f32.mrf.mxu0  ;;  %v1058_v8 = vld [vmem:[%s4472_s6] sm:$0xff] }
 0x1a1   :  { %v559_v56 = vpop.f32.mrf.mxu0 }
 0x1a2   :  { %3185 = vmatprep.mubr.msk.f32.mxu1 %vm281_vm1, %v559_v56  ;;  %v2750_v56 = vld [vmem:[%s4473_s7 + $0x98] sm:$0xff] }
 0x1a3   :  { %v3166_v57 = vpop.f32.mrf.mxu0  ;;  %3186 = vmatmul.mubr.msk.f32.vlgmr.msra.gmra.mxu1 %vm281_vm1, %v3163_v55  ;;  %v2719_v55 = vld [vmem:[%s4471_s5 + $0x80] sm:$0xff] }
 0x1a4   :  { %3214 = vmatpush3.msra.mxu1 %v888_v60 }
 0x1a5   :  { %v569_v58 = vpop.f32.mrf.mxu0  ;;  %3215 = vmatprep.subr.mxu1 %v887_v61 }
 0x1a6   :  { %3188 = vmatprep.mubr.msk.f32.mxu1 %vm281_vm1, %v569_v58  ;;  %3216 = vmatpush3.msra.mxu1 %v887_v61 }
 0x1a7   :  { %3189 = vmatmul.mubr.msk.f32.gmra.mxu1 %vm281_vm1, %v3166_v57  ;;  %3217 = vmatprep.subr.mxu1 %v886_v62 }
 0x1a8   :  { %3218 = vmatpush3.msra.mxu1 %v886_v62 }
 0x1a9   :  { %3219 = vmatprep.subr.mxu1 %v885_v63 }
 0x1aa   :  { %3220 = vmatpush3.msra.mxu1 %v885_v63  ;;  %v2749_v63 = vld [vmem:[%s4473_s7 + $0x90] sm:$0xff] }
 0x1ab   :  { %3221 = vmatprep.subr.mxu1 %v884_v0 }
 0x1ac   :  { %3222 = vmatpush3.msra.mxu1 %v884_v0  ;;  %v2748_v0 = vld [vmem:[%s4473_s7 + $0x88] sm:$0xff] }
 0x1ad   :  { %3223 = vmatprep.subr.mxu1 %v883_v1 }
 0x1ae   :  { %3224 = vmatpush3.msra.mxu1 %v883_v1  ;;  %v2747_v1 = vld [vmem:[%s4473_s7 + $0x80] sm:$0xff] }
 0x1af   :  { %3225 = vmatprep.subr.mxu1 %v882_v2 }
 0x1b0   :  { %3226 = vmatpush3.msra.mxu1 %v882_v2  ;;  %v2746_v2 = vld [vmem:[%s4473_s7 + $0x78] sm:$0xff] }
 0x1b1   :  { %3227 = vmatprep.subr.mxu1 %v881_v3 }
 0x1b2   :  { %3228 = vmatpush3.msra.mxu1 %v881_v3  ;;  %v2745_v3 = vld [vmem:[%s4473_s7 + $0x70] sm:$0xff] }
 0x1b3   :  { %3229 = vmatprep.subr.mxu1 %v880_v4 }
 0x1b4   :  { %3230 = vmatpush3.msra.mxu1 %v880_v4  ;;  %v2744_v4 = vld [vmem:[%s4473_s7 + $0x68] sm:$0xff] }
 0x1b5   :  { %3231 = vmatprep.subr.mxu1 %v879_v42 }
 0x1b6   :  { %3232 = vmatpush3.msra.mxu1 %v879_v42  ;;  %v2760_v42 = vld [vmem:[%s4473_s7 + $0xa8] sm:$0xff] }
 0x1b7   :  { %3233 = vmatprep.subr.mxu1 %v878_v44 }
 0x1b8   :  { %3234 = vmatpush3.msra.mxu1 %v878_v44 }
 0x1b9   :  { %3235 = vmatprep.subr.mxu1 %v877_v46 }
 0x1ba   :  { %3236 = vmatpush3.msra.mxu1 %v877_v46 }
 0x1bb   :  { %3237 = vmatprep.subr.mxu1 %v876_v48 }
 0x1bc   :  { %3238 = vmatpush3.msra.mxu1 %v876_v48  ;;  %v3589_v48 = vmov 0.0  }
 0x1bd   :  { %3239 = vmatprep.subr.mxu1 %v875_v50 }
 0x1be   :  { %3240 = vmatpush3.msra.mxu1 %v875_v50  ;;  %v2789_v50 = vld [vmem:[%s4476_s10 + $0xf0] sm:$0xff] }
 0x1bf   :  { %3241 = vmatprep.subr.mxu1 %v874_v52 }
 0x1c0   :  { %3242 = vmatpush3.msra.mxu1 %v874_v52  ;;  %v2787_v52 = vld [vmem:[%s4476_s10 + $0xe0] sm:$0xff] }
 0x1c1   :  { %3243 = vmatprep.subr.mxu1 %v873_v54 }
 0x1c2   :  { %3244 = vmatpush3.msra.mxu1 %v873_v54  ;;  %v2785_v54 = vld [vmem:[%s4476_s10 + $0xd0] sm:$0xff] }
 0x263   :  { %v3187_v9 = vpop.f32.mrf.mxu1 }
 0x264   :  { %v686_v16 = vadd.f32 %v3187_v9, %v463_v11 }
 0x265   :  { %v666_v10 = vpop.f32.mrf.mxu1 }
 0x266   :  { %v685_v20 = vadd.f32 %v666_v10, %v458_v14  ;;  %v697_v23 = vadd.f32 %v2712_v18, %v686_v16  ;;  %v2737_v16 = vld [vmem:[%s4472_s6 + $0x10] sm:$0xff] }
 0x267   :  { %v3190_v13 = vpop.f32.mrf.mxu1 }
 0x268   :  { %v688_v17 = vadd.f32 %v3190_v13, %v473_v12  ;;  %v696_v26 = vadd.f32 %v2712_v18, %v685_v20  ;;  %v701_v28 = vmax.f32 %v697_v23, 0.0  ;;  %v1149_v20 = vld [vmem:[%s4473_s7 + $0x38] sm:$0xff]  ;;  %v1146_v23 = vld [vmem:[%s4473_s7 + $0x20] sm:$0xff] }
 0x269   :  { %v676_v19 = vpop.f32.mrf.mxu1 }
 0x26a   :  { %v699_v21 = vadd.f32 %v2712_v18, %v688_v17  ;;  %v687_v22 = vadd.f32 %v676_v19, %v468_v15  ;;  %v700_v29 = vmax.f32 %v696_v26, 0.0  ;;  %v1059_v15 = vld [vmem:[%s4472_s6 + $0x8] sm:$0xff]  ;;  %v2738_v17 = vld [vmem:[%s4472_s6 + $0x18] sm:$0xff]  ;;  %v1150_v19 = vld [vmem:[%s4473_s7 + $0x40] sm:$0xff] }
 0x26b   :  { %v1143_v26 = vld [vmem:[%s4473_s7 + $0x8] sm:$0xff] }
 0x26c   :  { %v703_v24 = vmax.f32 %v699_v21, 0.0  ;;  %v698_v25 = vadd.f32 %v2712_v18, %v687_v22  ;;  %v1151_v18 = vld [vmem:[%s4473_s7 + $0x48] sm:$0xff]  ;;  %v1148_v21 = vld [vmem:[%s4473_s7 + $0x30] sm:$0xff] }
 0x26d   :  { %v1147_v22 = vld [vmem:[%s4473_s7 + $0x28] sm:$0xff] }
 0x26e   :  { %v702_v27 = vmax.f32 %v698_v25, 0.0  ;;  %3191 = vmatprep.subr.mxu0 %v703_v24  ;;  %v1144_v25 = vld [vmem:[%s4473_s7 + $0x10] sm:$0xff] }
 0x26f   :  { %3192 = vmatpush3.msra.mxu0 %v703_v24 }
 0x270   :  { %3193 = vmatprep.subr.mxu0 %v702_v27 }
 0x271   :  { %3194 = vmatpush3.msra.mxu0 %v702_v27 }
 0x272   :  { %3195 = vmatprep.subr.mxu0 %v701_v28 }
 0x273   :  { %3196 = vmatpush3.msra.mxu0 %v701_v28 }
 0x274   :  { %3197 = vmatprep.subr.mxu0 %v700_v29 }
 0x275   :  { %3198 = vmatpush3.msra.mxu0 %v700_v29 }
 0x276   :  { %3200 = vmatmul.mubr.msk.f32.vlgmr.msra.gmra.mxu0 %vm62_vm0, %v705_v30  ;;  %3202 = vmatprep.subr.mxu0 %v703_v24 }
 0x277   :  { %3203 = vmatpush3.msra.mxu0 %v703_v24  ;;  %3210 = vmatprep.mubr.msk.f32.mxu0 %vm62_vm0, %v2715_v31  ;;  %v1145_v24 = vld [vmem:[%s4473_s7 + $0x18] sm:$0xff]  ;;  %v2767_v31 = vld [vmem:[%s4473_s7 + $0xe0] sm:$0xff] }
 0x278   :  { %3204 = vmatprep.subr.mxu0 %v702_v27 }
 0x279   :  { %3205 = vmatpush3.msra.mxu0 %v702_v27  ;;  %v1142_v27 = vld [vmem:[%s4473_s7] sm:$0xff] }
 0x27a   :  { %3206 = vmatprep.subr.mxu0 %v701_v28 }
 0x27b   :  { %3207 = vmatpush3.msra.mxu0 %v701_v28  ;;  %v2768_v28 = vld [vmem:[%s4473_s7 + $0xe8] sm:$0xff] }
 0x27c   :  { %3208 = vmatprep.subr.mxu0 %v700_v29 }
 0x27d   :  { %3209 = vmatpush3.msra.mxu0 %v700_v29 }
 0x27e   :  { %3211 = vmatmul.mubr.msk.f32.vlgmr.msra.gmra.mxu0 %vm62_vm0, %v2716_v32  ;;  %3248 = vmatprep.subr.mxu0 %v2734_v33 }
 0x27f   :  { %3249 = vmatpush3.msra.mxu0 %v2734_v33  ;;  %v2766_v33 = vld [vmem:[%s4473_s7 + $0xd8] sm:$0xff] }
 0x280   :  { %3250 = vmatprep.subr.mxu0 %v2733_v34 }
 0x281   :  { %3251 = vmatpush3.msra.mxu0 %v2733_v34 }
 0x282   :  { %3252 = vmatprep.subr.mxu0 %v2732_v35 }
 0x283   :  { %3253 = vmatpush3.msra.mxu0 %v2732_v35  ;;  %v2755_v35 = vld [vmem:[%s4472_s6 + $0x20] sm:$0xff] }
 0x284   :  { %3254 = vmatprep.subr.mxu0 %v2731_v36 }
 0x285   :  { %3255 = vmatpush3.msra.mxu0 %v2731_v36  ;;  %v2765_v36 = vld [vmem:[%s4473_s7 + $0xd0] sm:$0xff] }
 0x286   :  { %3256 = vmatprep.subr.mxu0 %v2730_v37 }
 0x287   :  { %3257 = vmatpush3.msra.mxu0 %v2730_v37  ;;  %v2756_v37 = vld [vmem:[%s4472_s6 + $0x28] sm:$0xff] }
 0x288   :  { %3258 = vmatprep.subr.mxu0 %v2729_v38 }
 0x289   :  { %3259 = vmatpush3.msra.mxu0 %v2729_v38  ;;  %v2764_v38 = vld [vmem:[%s4473_s7 + $0xc8] sm:$0xff] }
 0x28a   :  { %3260 = vmatprep.subr.mxu0 %v2728_v39 }
 0x28b   :  { %3261 = vmatpush3.msra.mxu0 %v2728_v39  ;;  %v2763_v39 = vld [vmem:[%s4473_s7 + $0xc0] sm:$0xff] }
 0x28c   :  { %3262 = vmatprep.subr.mxu0 %v2727_v40 }
 0x28d   :  { %3263 = vmatpush3.msra.mxu0 %v2727_v40  ;;  %v2762_v40 = vld [vmem:[%s4473_s7 + $0xb8] sm:$0xff] }
 0x28e   :  { %3264 = vmatprep.subr.mxu0 %v2726_v41 }
 0x28f   :  { %3265 = vmatpush3.msra.mxu0 %v2726_v41  ;;  %v2761_v41 = vld [vmem:[%s4473_s7 + $0xb0] sm:$0xff] }
 0x290   :  { %3266 = vmatprep.subr.mxu0 %v2725_v43 }
 0x291   :  { %3267 = vmatpush3.msra.mxu0 %v2725_v43  ;;  %v2759_v43 = vld [vmem:[%s4473_s7 + $0xa0] sm:$0xff] }
 0x292   :  { %3268 = vmatprep.subr.mxu0 %v2724_v45 }
 0x293   :  { %3269 = vmatpush3.msra.mxu0 %v2724_v45 }
 0x294   :  { %3270 = vmatprep.subr.mxu0 %v2723_v47 }
 0x295   :  { %3271 = vmatpush3.msra.mxu0 %v2723_v47 }
 0x296   :  { %3272 = vmatprep.subr.mxu0 %v2722_v49 }
 0x297   :  { %3273 = vmatpush3.msra.mxu0 %v2722_v49  ;;  %v2790_v49 = vld [vmem:[%s4476_s10 + $0xf8] sm:$0xff] }
 0x298   :  { %3274 = vmatprep.subr.mxu0 %v2721_v51 }
 0x299   :  { %3275 = vmatpush3.msra.mxu0 %v2721_v51  ;;  %v2788_v51 = vld [vmem:[%s4476_s10 + $0xe8] sm:$0xff] }
 0x29a   :  { %3276 = vmatprep.subr.mxu0 %v2720_v53 }
 0x29b   :  { %3277 = vmatpush3.msra.mxu0 %v2720_v53  ;;  %v2786_v53 = vld [vmem:[%s4476_s10 + $0xd8] sm:$0xff] }
 0x29c   :  { %3278 = vmatprep.subr.mxu0 %v2719_v55 }
 0x29d   :  { %3279 = vmatpush3.msra.mxu0 %v2719_v55  ;;  %v2784_v55 = vld [vmem:[%s4476_s10 + $0xc8] sm:$0xff] }
 0x29e   :  { %3297 = vmatprep.subr.mxu0 %v2750_v56 }
 0x336   :  { %v3201_v57 = vpop.f32.mrf.mxu0 }
 0x338   :  { %v778_v58 = vpop.f32.mrf.mxu0 }
 0x33e   :  { %v3212_v59 = vpop.f32.mrf.mxu0 }
 0x33f   :  { %v872_v62 = vmax.f32 %v3201_v57, %v3212_v59  ;;  %v2782_v57 = vld [vmem:[%s4476_s10 + $0xb8] sm:$0xff]  ;;  %v2780_v59 = vld [vmem:[%s4476_s10 + $0xa8] sm:$0xff] }
 0x340   :  { %v862_v60 = vpop.f32.mrf.mxu0 }
 0x341   :  { %v871_v61 = vmax.f32 %v778_v58, %v862_v60  ;;  %v2781_v58 = vld [vmem:[%s4476_s10 + $0xb0] sm:$0xff]  ;;  %v2779_v60 = vld [vmem:[%s4476_s10 + $0xa0] sm:$0xff] }
 0x343   :  { %3245 = vmatprep.mubr.f32.mxu1 %v871_v61  ;;  %3280 = vmatprep.mubr.f32.mxu0 %v871_v61 }
 0x344   :  { %3246 = vmatmul.mubr.f32.vlgmr.msra.gmra.mxu1 %v872_v62  ;;  %3281 = vmatmul.mubr.f32.vlgmr.msra.gmra.mxu0 %v872_v62 }
 0x345   :  { %3298 = vmatpush3.msra.mxu0 %v2750_v56  ;;  %3287 = vmatprep.mubr.msk.f32.mxu1 %vm1060_vm2, %v1058_v8  ;;  %v2783_v56 = vld [vmem:[%s4476_s10 + $0xc0] sm:$0xff] }
 0x346   :  { %3299 = vmatprep.subr.mxu0 %v2749_v63 }
 0x347   :  { %3300 = vmatpush3.msra.mxu0 %v2749_v63 }
 0x348   :  { %3301 = vmatprep.subr.mxu0 %v2748_v0 }
 0x349   :  { %3302 = vmatpush3.msra.mxu0 %v2748_v0 }
 0x34a   :  { %3303 = vmatprep.subr.mxu0 %v2747_v1 }
 0x34b   :  { %3304 = vmatpush3.msra.mxu0 %v2747_v1  ;;  %v2771_v1 = vld [vmem:[%s4474_s8] ss:$0 sm:$0xff] }
 0x34c   :  { %3305 = vmatprep.subr.mxu0 %v2746_v2 }
 0x34d   :  { %3306 = vmatpush3.msra.mxu0 %v2746_v2 }
 0x34e   :  { %3307 = vmatprep.subr.mxu0 %v2745_v3 }
 0x34f   :  { %3308 = vmatpush3.msra.mxu0 %v2745_v3 }
 0x350   :  { %3309 = vmatprep.subr.mxu0 %v2744_v4 }
 0x351   :  { %3310 = vmatpush3.msra.mxu0 %v2744_v4 }
 0x352   :  { %3311 = vmatprep.subr.mxu0 %v2743_v5 }
 0x353   :  { %3312 = vmatpush3.msra.mxu0 %v2743_v5 }
 0x354   :  { %3313 = vmatprep.subr.mxu0 %v2742_v6 }
 0x355   :  { %3314 = vmatpush3.msra.mxu0 %v2742_v6 }
 0x356   :  { %3315 = vmatprep.subr.mxu0 %v2741_v7 }
 0x357   :  { %3316 = vmatpush3.msra.mxu0 %v2741_v7 }
 0x404   :  { %v3247_v9 = vpop.f32.mrf.mxu1  ;;  %v3282_v10 = vpop.f32.mrf.mxu0 }
 0x405   :  { %v4011_v11 = vmax.f32 %v3247_v9, %v3282_v10  ;;  %v1599_v10 = vld [vmem:[%s4475_s9] sm:$0xff] }
 0x406   :  { %v955_v12 = vpop.f32.mrf.mxu1  ;;  %v1047_v13 = vpop.f32.mrf.mxu0 }
 0x407   :  { %v4013_v14 = vmax.f32 %v955_v12, %v1047_v13  ;;  %3283 = vmatprep.subr.mxu1 %v4011_v11  ;;  %3343 = vmatprep.subr.mxu0 %v4011_v11  ;;  %v1764_v12 = vld [vmem:[%s4476_s10 + $0x78] sm:$0xff]  ;;  %v1763_v13 = vld [vmem:[%s4476_s10 + $0x70] sm:$0xff] }
 0x408   :  { %3284 = vmatpush3.msra.mxu1 %v4011_v11 }
 0x409   :  { %3285 = vmatprep.subr.mxu1 %v4013_v14 }
 0x40a   :  { %3286 = vmatpush3.msra.mxu1 %v4013_v14 }
 0x40b   :  { %3288 = vmatmul.mubr.msk.f32.vlgmr.msra.gmra.mxu1 %vm1060_vm2, %v1059_v15  ;;  %3290 = vmatprep.subr.mxu1 %v4011_v11  ;;  %v1761_v15 = vld [vmem:[%s4476_s10 + $0x60] sm:$0xff] }
 0x40c   :  { %3291 = vmatpush3.msra.mxu1 %v4011_v11  ;;  %3294 = vmatprep.mubr.msk.f32.mxu1 %vm1060_vm2, %v2737_v16  ;;  %v1760_v16 = vld [vmem:[%s4476_s10 + $0x58] sm:$0xff] }
 0x40d   :  { %3292 = vmatprep.subr.mxu1 %v4013_v14 }
 0x40e   :  { %3293 = vmatpush3.msra.mxu1 %v4013_v14 }
 0x40f   :  { %3295 = vmatmul.mubr.msk.f32.vlgmr.msra.gmra.mxu1 %vm1060_vm2, %v2738_v17  ;;  %3320 = vmatprep.subr.mxu1 %v1151_v18  ;;  %v1759_v17 = vld [vmem:[%s4476_s10 + $0x50] sm:$0xff] }
 0x410   :  { %3321 = vmatpush3.msra.mxu1 %v1151_v18  ;;  %v1758_v18 = vld [vmem:[%s4476_s10 + $0x48] sm:$0xff] }
 0x411   :  { %3322 = vmatprep.subr.mxu1 %v1150_v19 }
 0x412   :  { %3323 = vmatpush3.msra.mxu1 %v1150_v19  ;;  %v1757_v19 = vld [vmem:[%s4476_s10 + $0x40] sm:$0xff] }
 0x413   :  { %3324 = vmatprep.subr.mxu1 %v1149_v20 }
 0x414   :  { %3325 = vmatpush3.msra.mxu1 %v1149_v20  ;;  %v1756_v20 = vld [vmem:[%s4476_s10 + $0x38] sm:$0xff] }
 0x415   :  { %3326 = vmatprep.subr.mxu1 %v1148_v21 }
 0x416   :  { %3327 = vmatpush3.msra.mxu1 %v1148_v21  ;;  %v1755_v21 = vld [vmem:[%s4476_s10 + $0x30] sm:$0xff] }
 0x417   :  { %3328 = vmatprep.subr.mxu1 %v1147_v22 }
 0x418   :  { %3329 = vmatpush3.msra.mxu1 %v1147_v22  ;;  %v1754_v22 = vld [vmem:[%s4476_s10 + $0x28] sm:$0xff] }
 0x419   :  { %3330 = vmatprep.subr.mxu1 %v1146_v23 }
 0x41a   :  { %3331 = vmatpush3.msra.mxu1 %v1146_v23  ;;  %v1753_v23 = vld [vmem:[%s4476_s10 + $0x20] sm:$0xff] }
 0x41b   :  { %3332 = vmatprep.subr.mxu1 %v1145_v24 }
 0x41c   :  { %3333 = vmatpush3.msra.mxu1 %v1145_v24  ;;  %v1752_v24 = vld [vmem:[%s4476_s10 + $0x18] sm:$0xff] }
 0x41d   :  { %3334 = vmatprep.subr.mxu1 %v1144_v25 }
 0x41e   :  { %3335 = vmatpush3.msra.mxu1 %v1144_v25  ;;  %v2778_v25 = vld [vmem:[%s4476_s10 + $0x98] sm:$0xff] }
 0x41f   :  { %3336 = vmatprep.subr.mxu1 %v1143_v26 }
 0x420   :  { %3337 = vmatpush3.msra.mxu1 %v1143_v26  ;;  %v1751_v26 = vld [vmem:[%s4476_s10 + $0x10] sm:$0xff] }
 0x421   :  { %3338 = vmatprep.subr.mxu1 %v1142_v27 }
 0x422   :  { %3339 = vmatpush3.msra.mxu1 %v1142_v27  ;;  %v2777_v27 = vld [vmem:[%s4476_s10 + $0x90] sm:$0xff] }
 0x423   :  { %3350 = vmatprep.subr.mxu1 %v2768_v28 }
 0x4cb   :  { %v3289_v29 = vpop.f32.mrf.mxu1 }
 0x4cd   :  { %v1133_v30 = vpop.f32.mrf.mxu1 }
 0x4ce   :  { %3340 = vmatprep.mubr.msk.f32.mxu1 %vm1247_vm3, %v1133_v30  ;;  %v1749_v30 = vld [vmem:[%s4476_s10] sm:$0xff] }
 0x4cf   :  { %v3296_v32 = vpop.f32.mrf.mxu1  ;;  %3341 = vmatmul.mubr.msk.f32.vlgmr.msra.gmra.mxu1 %vm1247_vm3, %v3289_v29  ;;  %v2776_v29 = vld [vmem:[%s4476_s10 + $0x88] sm:$0xff] }
 0x4d0   :  { %3351 = vmatpush3.msra.mxu1 %v2768_v28  ;;  %v1750_v28 = vld [vmem:[%s4476_s10 + $0x8] sm:$0xff] }
 0x4d1   :  { %v1227_v34 = vpop.f32.mrf.mxu1  ;;  %3352 = vmatprep.subr.mxu1 %v2767_v31 }
 0x4d2   :  { %3317 = vmatprep.mubr.msk.f32.mxu0 %vm1247_vm3, %v1227_v34  ;;  %3353 = vmatpush3.msra.mxu1 %v2767_v31  ;;  %v2775_v31 = vld [vmem:[%s4476_s10 + $0x80] sm:$0xff] }
 0x4d3   :  { %3318 = vmatmul.mubr.msk.f32.vlgmr.msra.gmra.mxu0 %vm1247_vm3, %v3296_v32  ;;  %3354 = vmatprep.subr.mxu1 %v2766_v33 }
 0x4d4   :  { %3344 = vmatpush3.msra.mxu0 %v4011_v11  ;;  %3347 = vmatprep.mubr.msk.f32.mxu0 %vm1060_vm2, %v2755_v35  ;;  %v2773_v11 = vld [vmem:[%s4475_s9 + $0x8] sm:$0xff] }
 0x4d5   :  { %3345 = vmatprep.subr.mxu0 %v4013_v14  ;;  %3355 = vmatpush3.msra.mxu1 %v2766_v33 }
 0x4d6   :  { %3346 = vmatpush3.msra.mxu0 %v4013_v14  ;;  %3356 = vmatprep.subr.mxu1 %v2765_v36  ;;  %v1762_v14 = vld [vmem:[%s4476_s10 + $0x68] sm:$0xff] }
 0x4d7   :  { %3348 = vmatmul.mubr.msk.f32.vlgmr.msra.gmra.mxu0 %vm1060_vm2, %v2756_v37  ;;  %3357 = vmatpush3.msra.mxu1 %v2765_v36  ;;  %v2005_v37 = vld [vmem:[%s4478_s12 + $0x38] sm:$0xff] }
 0x4d8   :  { %3358 = vmatprep.subr.mxu1 %v2764_v38  ;;  %3373 = vmatprep.subr.mxu0 %v3589_v48 }
 0x4d9   :  { %3359 = vmatpush3.msra.mxu1 %v2764_v38  ;;  %3377 = vmatprep.mubr.msk.f32.mxu0 %vm3590_vm4, %v3589_v48  ;;  %v2004_v38 = vld [vmem:[%s4478_s12 + $0x30] sm:$0xff] }
 0x4da   :  { %3360 = vmatprep.subr.mxu1 %v2763_v39 }
 0x4db   :  { %3361 = vmatpush3.msra.mxu1 %v2763_v39  ;;  %v2003_v39 = vld [vmem:[%s4478_s12 + $0x28] sm:$0xff] }
 0x4dc   :  { %3362 = vmatprep.subr.mxu1 %v2762_v40 }
 0x4dd   :  { %3363 = vmatpush3.msra.mxu1 %v2762_v40  ;;  %v2002_v40 = vld [vmem:[%s4478_s12 + $0x20] sm:$0xff] }
 0x4de   :  { %3364 = vmatprep.subr.mxu1 %v2761_v41 }
 0x4df   :  { %3365 = vmatpush3.msra.mxu1 %v2761_v41  ;;  %v2001_v41 = vld [vmem:[%s4478_s12 + $0x18] sm:$0xff] }
 0x4e0   :  { %3366 = vmatprep.subr.mxu1 %v2760_v42 }
 0x4e1   :  { %3367 = vmatpush3.msra.mxu1 %v2760_v42  ;;  %v2000_v42 = vld [vmem:[%s4478_s12 + $0x10] sm:$0xff] }
 0x4e2   :  { %3368 = vmatprep.subr.mxu1 %v2759_v43 }
 0x4e3   :  { %3369 = vmatpush3.msra.mxu1 %v2759_v43  ;;  %v1999_v43 = vld [vmem:[%s4478_s12 + $0x8] sm:$0xff] }
 0x4e4   :  { %3422 = vmatprep.subr.mxu1 %v3589_v48 }
 0x58f   :  { %v3342_v61 = vpop.f32.mrf.mxu1 }
 0x591   :  { %v1401_v62 = vpop.f32.mrf.mxu1 }
 0x593   :  { %v3319_v44 = vpop.f32.mrf.mxu0 }
 0x594   :  { %v1407_v63 = vadd.f32 %v3342_v61, %v3319_v44  ;;  %v2813_v61 = vld [vmem:[%s4478_s12 + $0xb8] sm:$0xff] }
 0x595   :  { %v1320_v45 = vpop.f32.mrf.mxu0 }
 0x596   :  { %v1402_v2 = vadd.f32 %v1401_v62, %v1320_v45 }
 0x597   :  { %v3349_v46 = vpop.f32.mrf.mxu0 }
 0x599   :  { %v1485_v47 = vpop.f32.mrf.mxu0 }
 0x59a   :  { %3370 = vmatprep.mubr.msk.f32.mxu1 %vm1247_vm3, %v1485_v47  ;;  %v1923_v47 = vld [vmem:[%s4477_s11] sm:$0x3] }
 0x59b   :  { %3371 = vmatmul.mubr.msk.f32.vlgmr.msra.gmra.mxu1 %vm1247_vm3, %v3349_v46 }
 0x59c   :  { %3454 = vmatprep.mubr.msk.f32.mxu1 %vm3590_vm4, %v3589_v48  ;;  %3423 = vmatpush3.msra.mxu1 %v2790_v49 }
 0x59d   :  { %3424 = vmatprep.subr.mxu1 %v3589_v48 }
 0x59e   :  { %3425 = vmatpush3.msra.mxu1 %v2789_v50 }
 0x59f   :  { %3426 = vmatprep.subr.mxu1 %v3589_v48 }
 0x5a0   :  { %3427 = vmatpush3.msra.mxu1 %v2788_v51  ;;  %v2792_v51 = vld [vmem:[%s4477_s11 + $0x2] sm:$0x3] }
 0x5a1   :  { %3428 = vmatprep.subr.mxu1 %v3589_v48 }
 0x5a2   :  { %3429 = vmatpush3.msra.mxu1 %v2787_v52  ;;  %v2801_v52 = vld [vmem:[%s4478_s12 + $0x78] sm:$0xff] }
 0x5a3   :  { %3430 = vmatprep.subr.mxu1 %v3589_v48 }
 0x5a4   :  { %3431 = vmatpush3.msra.mxu1 %v2786_v53  ;;  %v2800_v53 = vld [vmem:[%s4478_s12 + $0x70] sm:$0xff] }
 0x5a5   :  { %3432 = vmatprep.subr.mxu1 %v3589_v48 }
 0x5a6   :  { %3433 = vmatpush3.msra.mxu1 %v2785_v54  ;;  %v2799_v54 = vld [vmem:[%s4478_s12 + $0x68] sm:$0xff] }
 0x5a7   :  { %3434 = vmatprep.subr.mxu1 %v3589_v48 }
 0x5a8   :  { %3435 = vmatpush3.msra.mxu1 %v2784_v55  ;;  %v2798_v55 = vld [vmem:[%s4478_s12 + $0x60] sm:$0xff] }
 0x5a9   :  { %3436 = vmatprep.subr.mxu1 %v3589_v48 }
 0x5aa   :  { %3437 = vmatpush3.msra.mxu1 %v2783_v56  ;;  %v2797_v56 = vld [vmem:[%s4478_s12 + $0x58] sm:$0xff] }
 0x5ab   :  { %3438 = vmatprep.subr.mxu1 %v3589_v48 }
 0x5ac   :  { %3439 = vmatpush3.msra.mxu1 %v2782_v57  ;;  %v2796_v57 = vld [vmem:[%s4478_s12 + $0x50] sm:$0xff] }
 0x5ad   :  { %3440 = vmatprep.subr.mxu1 %v3589_v48 }
 0x5ae   :  { %3441 = vmatpush3.msra.mxu1 %v2781_v58  ;;  %v2795_v58 = vld [vmem:[%s4478_s12 + $0x48] sm:$0xff] }
 0x5af   :  { %3442 = vmatprep.subr.mxu1 %v3589_v48 }
 0x5b0   :  { %3443 = vmatpush3.msra.mxu1 %v2780_v59  ;;  %v1998_v59 = vld [vmem:[%s4478_s12] sm:$0xff] }
 0x5b1   :  { %3444 = vmatprep.subr.mxu1 %v3589_v48 }
 0x5b2   :  { %3445 = vmatpush3.msra.mxu1 %v2779_v60  ;;  %v2794_v60 = vld [vmem:[%s4478_s12 + $0x40] sm:$0xff] }
 0x5b3   :  { %3446 = vmatprep.subr.mxu1 %v3589_v48 }
 0x5b4   :  { %3447 = vmatpush3.msra.mxu1 %v2778_v25 }
 0x5b5   :  { %3448 = vmatprep.subr.mxu1 %v3589_v48 }
 0x5b6   :  { %3449 = vmatpush3.msra.mxu1 %v2777_v27 }
 0x5b7   :  { %3450 = vmatprep.subr.mxu1 %v3589_v48 }
 0x5b8   :  { %3451 = vmatpush3.msra.mxu1 %v2776_v29  ;;  %v2564_v29 = vld [vmem:[%s4480_s14 + $0x10] sm:$0xff] }
 0x5b9   :  { %3452 = vmatprep.subr.mxu1 %v3589_v48 }
 0x5ba   :  { %3453 = vmatpush3.msra.mxu1 %v2775_v31  ;;  %v2562_v31 = vld [vmem:[%s4480_s14] sm:$0xff] }
 0x5bb   :  { %3486 = vmatprep.subr.mxu1 %v3589_v48 }
 0x65b   :  { %v3372_v0 = vpop.f32.mrf.mxu1 }
 0x65c   :  { %v1587_v3 = vadd.f32 %v3372_v0, %v1407_v63  ;;  %v2812_v63 = vld [vmem:[%s4478_s12 + $0xb0] sm:$0xff] }
 0x65d   :  { %v1577_v4 = vpop.f32.mrf.mxu1 }
 0x65e   :  { %v1596_v5 = vadd.f32 %v2771_v1, %v1587_v3  ;;  %v1586_v6 = vadd.f32 %v1577_v4, %v1402_v2  ;;  %v2811_v2 = vld [vmem:[%s4478_s12 + $0xa8] sm:$0xff]  ;;  %v2804_v4 = vld [vmem:[%s4477_s11 + $0x4] sm:$0x3] }
 0x660   :  { %v1598_v7 = vmax.f32 %v1596_v5, 0.0  ;;  %v1595_v8 = vadd.f32 %v2771_v1, %v1586_v6  ;;  %v2810_v5 = vld [vmem:[%s4478_s12 + $0xa0] sm:$0xff] }
 0x661   :  { %v2815_v6 = vld [vmem:[%s4477_s11 + $0x6] sm:$0x3] }
 0x662   :  { %v1597_v9 = vmax.f32 %v1595_v8, 0.0  ;;  %3374 = vmatpush3.msra.mxu0 %v1598_v7  ;;  %v2823_v8 = vld [vmem:[%s4478_s12 + $0xf0] sm:$0xff] }
 0x663   :  { %3375 = vmatprep.subr.mxu0 %v3589_v48 }
 0x664   :  { %3376 = vmatpush3.msra.mxu0 %v1597_v9 }
 0x665   :  { %3378 = vmatmul.mubr.msk.f32.vlgmr.msra.gmra.mxu0 %vm1060_vm2, %v1599_v10  ;;  %3380 = vmatprep.subr.mxu0 %v3589_v48  ;;  %v2822_v10 = vld [vmem:[%s4478_s12 + $0xe8] sm:$0xff] }
 0x666   :  { %3381 = vmatpush3.msra.mxu0 %v1598_v7  ;;  %3384 = vmatprep.mubr.msk.f32.mxu0 %vm3590_vm4, %v3589_v48  ;;  %v2824_v7 = vld [vmem:[%s4478_s12 + $0xf8] sm:$0xff] }
 0x667   :  { %3382 = vmatprep.subr.mxu0 %v3589_v48 }
 0x668   :  { %3383 = vmatpush3.msra.mxu0 %v1597_v9  ;;  %v2809_v9 = vld [vmem:[%s4478_s12 + $0x98] sm:$0xff] }
 0x669   :  { %3385 = vmatmul.mubr.msk.f32.vlgmr.msra.gmra.mxu0 %vm1060_vm2, %v2773_v11  ;;  %3387 = vmatprep.subr.mxu0 %v3589_v48  ;;  %v2808_v11 = vld [vmem:[%s4478_s12 + $0x90] sm:$0xff] }
 0x66a   :  { %3388 = vmatpush3.msra.mxu0 %v1764_v12  ;;  %3419 = vmatprep.mubr.msk.f32.mxu0 %vm3590_vm4, %v3589_v48  ;;  %v2821_v12 = vld [vmem:[%s4478_s12 + $0xe0] sm:$0xff] }
 0x66b   :  { %3389 = vmatprep.subr.mxu0 %v3589_v48 }
 0x66c   :  { %3390 = vmatpush3.msra.mxu0 %v1763_v13  ;;  %v2807_v13 = vld [vmem:[%s4478_s12 + $0x88] sm:$0xff] }
 0x66d   :  { %3391 = vmatprep.subr.mxu0 %v3589_v48 }
 0x66e   :  { %3392 = vmatpush3.msra.mxu0 %v1762_v14  ;;  %v2820_v14 = vld [vmem:[%s4478_s12 + $0xd8] sm:$0xff] }
 0x66f   :  { %3393 = vmatprep.subr.mxu0 %v3589_v48 }
 0x670   :  { %3394 = vmatpush3.msra.mxu0 %v1761_v15  ;;  %v2806_v15 = vld [vmem:[%s4478_s12 + $0x80] sm:$0xff] }
 0x671   :  { %3395 = vmatprep.subr.mxu0 %v3589_v48 }
 0x672   :  { %3396 = vmatpush3.msra.mxu0 %v1760_v16  ;;  %v2819_v16 = vld [vmem:[%s4478_s12 + $0xd0] sm:$0xff] }
 0x673   :  { %3397 = vmatprep.subr.mxu0 %v3589_v48 }
 0x674   :  { %3398 = vmatpush3.msra.mxu0 %v1759_v17  ;;  %v2818_v17 = vld [vmem:[%s4478_s12 + $0xc8] sm:$0xff] }
 0x675   :  { %3399 = vmatprep.subr.mxu0 %v3589_v48 }
 0x676   :  { %3400 = vmatpush3.msra.mxu0 %v1758_v18  ;;  %v2817_v18 = vld [vmem:[%s4478_s12 + $0xc0] sm:$0xff] }
 0x677   :  { %3401 = vmatprep.subr.mxu0 %v3589_v48 }
 0x678   :  { %3402 = vmatpush3.msra.mxu0 %v1757_v19 }
 0x679   :  { %3403 = vmatprep.subr.mxu0 %v3589_v48 }
 0x67a   :  { %3404 = vmatpush3.msra.mxu0 %v1756_v20 }
 0x67b   :  { %3405 = vmatprep.subr.mxu0 %v3589_v48 }
 0x67c   :  { %3406 = vmatpush3.msra.mxu0 %v1755_v21 }
 0x67d   :  { %3407 = vmatprep.subr.mxu0 %v3589_v48 }
 0x67e   :  { %3408 = vmatpush3.msra.mxu0 %v1754_v22 }
 0x67f   :  { %3409 = vmatprep.subr.mxu0 %v3589_v48 }
 0x680   :  { %3410 = vmatpush3.msra.mxu0 %v1753_v23 }
 0x681   :  { %3411 = vmatprep.subr.mxu0 %v3589_v48 }
 0x682   :  { %3412 = vmatpush3.msra.mxu0 %v1752_v24 }
 0x683   :  { %3413 = vmatprep.subr.mxu0 %v3589_v48 }
 0x684   :  { %3414 = vmatpush3.msra.mxu0 %v1751_v26 }
 0x685   :  { %3415 = vmatprep.subr.mxu0 %v3589_v48 }
 0x686   :  { %3416 = vmatpush3.msra.mxu0 %v1750_v28  ;;  %v2565_v28 = vld [vmem:[%s4480_s14 + $0x18] sm:$0xff] }
 0x687   :  { %3417 = vmatprep.subr.mxu0 %v3589_v48 }
 0x688   :  { %3418 = vmatpush3.msra.mxu0 %v1749_v30  ;;  %v2563_v30 = vld [vmem:[%s4480_s14 + $0x8] sm:$0xff]  ;;  %s3591_s14 = smov [#allocation2]  }
 0x689   :  { %3457 = vmatprep.subr.mxu0 %v3589_v48  ;;  %s2654_s28 = sshll.u32 %s3591_s14, 4  ;;  %s2655_s28 = int_to_ptr.vmem [resolvable:$true] %s2654_s28 }
 0x68a   :  { %s3567_s8 = scalar_lea.vmem %s2655_s28, 32  ;;  %p3572_p1 = scmp.lt.s32.totalorder %s2655_s28, %s2655_s28 }
 0x68b   :  { %p3568_p0 = scmp.ne.s32.totalorder %s2655_s28, %s3567_s8  ;;  %p3573_p2 = scmp.lt.s32.totalorder %s3567_s8, %s3567_s8 }
 0x68d   :  { %p3574_p3 = por %p3573_p2, %p3572_p1 }
 0x68f   :  { %p3575_p4 = pnand %p3574_p3, %p3568_p0 }
 0x725   :  { %v1669_v32 = vpop.f32.mrf.mxu0 }
 0x727   :  { %v3379_v33 = vpop.f32.mrf.mxu0 }
 0x729   :  { %v1744_v34 = vpop.f32.mrf.mxu0 }
 0x72a   :  { %v1748_v35 = vmax.f32 %v1669_v32, %v1744_v34 }
 0x72b   :  { %v3386_v36 = vpop.f32.mrf.mxu0 }
 0x72c   :  { %3420 = vmatmul.mubr.f32.vlgmr.msra.gmra.mxu0 %v1748_v35  ;;  %3455 = vmatmul.mubr.f32.vlgmr.msra.gmra.mxu1 %v1748_v35  ;;  %v2826_v36 = vld [vmem:[%s4479_s13] ss:$0 sm:$0xff] }
 0x72d   :  { %3459 = vmatprep.mubr.msk.f32.mxu0 %vm3590_vm4, %v3589_v48  ;;  %3502 = vmatprep.mubr.msk.f32.mxu1 %vm3590_vm4, %v3589_v48 }
 0x72e   :  { %3487 = vmatpush3.msra.mxu1 %v2005_v37 }
 0x72f   :  { %3488 = vmatprep.subr.mxu1 %v3589_v48 }
 0x730   :  { %3489 = vmatpush3.msra.mxu1 %v2004_v38 }
 0x731   :  { %3490 = vmatprep.subr.mxu1 %v3589_v48 }
 0x732   :  { %3491 = vmatpush3.msra.mxu1 %v2003_v39 }
 0x733   :  { %3492 = vmatprep.subr.mxu1 %v3589_v48 }
 0x734   :  { %3493 = vmatpush3.msra.mxu1 %v2002_v40 }
 0x735   :  { %3494 = vmatprep.subr.mxu1 %v3589_v48 }
 0x736   :  { %3495 = vmatpush3.msra.mxu1 %v2001_v41  ;;  %v2827_v41 = vld [vmem:[%s4481_s15] ss:$0 sm:$0xff] }
 0x737   :  { %3496 = vmatprep.subr.mxu1 %v3589_v48 }
 0x738   :  { %3497 = vmatpush3.msra.mxu1 %v2000_v42 }
 0x739   :  { %3498 = vmatprep.subr.mxu1 %v3589_v48 }
 0x73a   :  { %3499 = vmatpush3.msra.mxu1 %v1999_v43 }
 0x73b   :  { %3500 = vmatprep.subr.mxu1 %v3589_v48 }
 0x73c   :  { %3501 = vmatpush3.msra.mxu1 %v1998_v59 }
 0x73d   :  { %3510 = vmatprep.subr.mxu1 %v3589_v48 }
 0x7ec   :  { %v1831_v44 = vpop.f32.mrf.mxu0  ;;  %v1918_v45 = vpop.f32.mrf.mxu1 }
 0x7ed   :  { %v4298_v46 = vmax.f32 %v1831_v44, %v1918_v45 }
 0x7ee   :  { %v3421_v49 = vpop.f32.mrf.mxu0  ;;  %v3456_v50 = vpop.f32.mrf.mxu1 }
 0x7ef   :  { %3458 = vmatpush3.msra.mxu0 %v4298_v46 }
 0x7f0   :  { %3460 = vmatmul.mubr.msk.f32.vlgmr.msra.gmra.mxu0 %vm1924_vm5, %v1923_v47  ;;  %3462 = vmatprep.subr.mxu0 %v3589_v48 }
 0x7f1   :  { %3463 = vmatpush3.msra.mxu0 %v4298_v46  ;;  %3464 = vmatprep.mubr.msk.f32.mxu0 %vm3590_vm4, %v3589_v48 }
 0x7f2   :  { %3467 = vmatprep.subr.mxu0 %v3589_v48 }
 0x7f4   :  { %3465 = vmatmul.mubr.msk.f32.vlgmr.msra.gmra.mxu0 %vm1924_vm5, %v2792_v51 }
 0x7f5   :  { %3468 = vmatpush3.msra.mxu0 %v2801_v52  ;;  %3483 = vmatprep.mubr.msk.f32.mxu0 %vm3590_vm4, %v3589_v48 }
 0x7f6   :  { %3469 = vmatprep.subr.mxu0 %v3589_v48 }
 0x7f7   :  { %3470 = vmatpush3.msra.mxu0 %v2800_v53 }
 0x7f8   :  { %3471 = vmatprep.subr.mxu0 %v3589_v48 }
 0x7f9   :  { %3472 = vmatpush3.msra.mxu0 %v2799_v54 }
 0x7fa   :  { %3473 = vmatprep.subr.mxu0 %v3589_v48 }
 0x7fb   :  { %3474 = vmatpush3.msra.mxu0 %v2798_v55 }
 0x7fc   :  { %3475 = vmatprep.subr.mxu0 %v3589_v48 }
 0x7fd   :  { %3476 = vmatpush3.msra.mxu0 %v2797_v56 }
 0x7fe   :  { %3477 = vmatprep.subr.mxu0 %v3589_v48 }
 0x7ff   :  { %3478 = vmatpush3.msra.mxu0 %v2796_v57 }
 0x800   :  { %3479 = vmatprep.subr.mxu0 %v3589_v48 }
 0x801   :  { %3480 = vmatpush3.msra.mxu0 %v2795_v58 }
 0x802   :  { %3481 = vmatprep.subr.mxu0 %v3589_v48 }
 0x803   :  { %3482 = vmatpush3.msra.mxu0 %v2794_v60 }
 0x804   :  { %3505 = vmatprep.subr.mxu0 %v3589_v48 }
 0x8b0   :  { %v1994_v62 = vpop.f32.mrf.mxu0 }
 0x8b1   :  { %3503 = vmatmul.mubr.msk.f32.vlgmr.msra.gmra.mxu1 %vm2090_vm6, %v1994_v62 }
 0x8b2   :  { %v3461_v0 = vpop.f32.mrf.mxu0  ;;  %3511 = vmatpush3.msra.mxu1 %v2813_v61  ;;  %3526 = vmatprep.mubr.msk.f32.mxu1 %vm3590_vm4, %v3589_v48 }
 0x8b3   :  { %3512 = vmatprep.subr.mxu1 %v3589_v48 }
 0x8b4   :  { %v2077_v1 = vpop.f32.mrf.mxu0  ;;  %3513 = vmatpush3.msra.mxu1 %v2812_v63 }
 0x8b5   :  { %3484 = vmatmul.mubr.msk.f32.vlgmr.msra.gmra.mxu0 %vm2090_vm6, %v2077_v1  ;;  %3514 = vmatprep.subr.mxu1 %v3589_v48 }
 0x8b6   :  { %3506 = vmatpush3.msra.mxu0 %v4298_v46  ;;  %v3466_v3 = vpop.f32.mrf.mxu0  ;;  %3507 = vmatprep.mubr.msk.f32.mxu0 %vm3590_vm4, %v3589_v48 }
 0x8b7   :  { %3529 = vmatprep.subr.mxu0 %v3589_v48  ;;  %3515 = vmatpush3.msra.mxu1 %v2811_v2 }
 0x8b8   :  { %3516 = vmatprep.subr.mxu1 %v3589_v48 }
 0x8b9   :  { %3508 = vmatmul.mubr.msk.f32.vlgmr.msra.gmra.mxu0 %vm1924_vm5, %v2804_v4  ;;  %3517 = vmatpush3.msra.mxu1 %v2810_v5 }
 0x8ba   :  { %3530 = vmatpush3.msra.mxu0 %v4298_v46  ;;  %3531 = vmatprep.mubr.msk.f32.mxu0 %vm3590_vm4, %v3589_v48 }
 0x8bb   :  { %3534 = vmatprep.subr.mxu0 %v3589_v48  ;;  %3518 = vmatprep.subr.mxu1 %v3589_v48 }
 0x8bc   :  { %3519 = vmatpush3.msra.mxu1 %v2809_v9 }
 0x8bd   :  { %3532 = vmatmul.mubr.msk.f32.vlgmr.msra.gmra.mxu0 %vm1924_vm5, %v2815_v6  ;;  %3520 = vmatprep.subr.mxu1 %v3589_v48 }
 0x8be   :  { %3535 = vmatpush3.msra.mxu0 %v2824_v7  ;;  %3550 = vmatprep.mubr.msk.f32.mxu0 %vm3590_vm4, %v3589_v48 }
 0x8bf   :  { %3536 = vmatprep.subr.mxu0 %v3589_v48  ;;  %3521 = vmatpush3.msra.mxu1 %v2808_v11 }
 0x8c0   :  { %3537 = vmatpush3.msra.mxu0 %v2823_v8  ;;  %3522 = vmatprep.subr.mxu1 %v3589_v48 }
 0x8c1   :  { %3538 = vmatprep.subr.mxu0 %v3589_v48  ;;  %3523 = vmatpush3.msra.mxu1 %v2807_v13 }
 0x8c2   :  { %3539 = vmatpush3.msra.mxu0 %v2822_v10  ;;  %3524 = vmatprep.subr.mxu1 %v3589_v48 }
 0x8c3   :  { %3540 = vmatprep.subr.mxu0 %v3589_v48  ;;  %3525 = vmatpush3.msra.mxu1 %v2806_v15 }
 0x8c4   :  { %3541 = vmatpush3.msra.mxu0 %v2821_v12  ;;  %3553 = vmatprep.subr.mxu1 %v3589_v48 }
 0x8c5   :  { %3542 = vmatprep.subr.mxu0 %v3589_v48 }
 0x8c6   :  { %3543 = vmatpush3.msra.mxu0 %v2820_v14 }
 0x8c7   :  { %3544 = vmatprep.subr.mxu0 %v3589_v48 }
 0x8c8   :  { %3545 = vmatpush3.msra.mxu0 %v2819_v16 }
 0x8c9   :  { %3546 = vmatprep.subr.mxu0 %v3589_v48 }
 0x8ca   :  { %3547 = vmatpush3.msra.mxu0 %v2818_v17 }
 0x8cb   :  { %3548 = vmatprep.subr.mxu0 %v3589_v48 }
 0x8cc   :  { %3549 = vmatpush3.msra.mxu0 %v2817_v18 }
 0x971   :  { %v2233_v19 = vpop.f32.mrf.mxu1 }
 0x973   :  { %v3504_v20 = vpop.f32.mrf.mxu1 }
 0x975   :  { %v2160_v21 = vpop.f32.mrf.mxu0 }
 0x976   :  { %v2234_v22 = vadd.f32 %v2233_v19, %v2160_v21 }
 0x977   :  { %v3485_v23 = vpop.f32.mrf.mxu0 }
 0x979   :  { %v2308_v24 = vpop.f32.mrf.mxu0 }
 0x97a   :  { %3527 = vmatmul.mubr.msk.f32.vlgmr.msra.gmra.mxu1 %vm2090_vm6, %v2308_v24 }
 0x97b   :  { %v3509_v25 = vpop.f32.mrf.mxu0  ;;  %3561 = vmatprep.mubr.msk.f32.mxu1 %vm3590_vm4, %v3589_v48  ;;  %3554 = vmatpush3.msra.mxu1 %v2565_v28 }
 0x97c   :  { %3555 = vmatprep.subr.mxu1 %v3589_v48 }
 0x97d   :  { %v2466_v26 = vpop.f32.mrf.mxu0  ;;  %3556 = vmatpush3.msra.mxu1 %v2564_v29 }
 0x97e   :  { %3551 = vmatmul.mubr.msk.f32.vlgmr.msra.gmra.mxu0 %vm2090_vm6, %v2466_v26  ;;  %3557 = vmatprep.subr.mxu1 %v3589_v48 }
 0x97f   :  { %v3533_v27 = vpop.f32.mrf.mxu0  ;;  %3558 = vmatpush3.msra.mxu1 %v2563_v30 }
 0x980   :  { %3559 = vmatprep.subr.mxu1 %v3589_v48 }
 0x981   :  { %3560 = vmatpush3.msra.mxu1 %v2562_v31 }
 0xa3a   :  { %v2390_v32 = vpop.f32.mrf.mxu1 }
 0xa3b   :  { %v2394_v34 = vadd.f32 %v2390_v32, %v2234_v22 }
 0xa3c   :  { %v3528_v33 = vpop.f32.mrf.mxu1 }
 0xa3e   :  { %v2548_v35 = vpop.f32.mrf.mxu0 }
 0xa3f   :  { %v2552_v37 = vadd.f32 %v2548_v35, %v2394_v34 }
 0xa40   :  { %v3552_v38 = vpop.f32.mrf.mxu0 }
 0xa41   :  { %v2560_v39 = vadd.f32 %v2826_v36, %v2552_v37 }
 0xa43   :  { %v2561_v40 = vmax.f32 %v2560_v39, 0.0 }
 0xa45   :  { %3562 = vmatmul.mubr.msk.f32.vlgmr.msra.gmra.mxu1 %vm62_vm0, %v2561_v40 }
 0xb05   :  { %v2642_v48 = vpop.f32.mrf.mxu1 }
 0xb06   :  { %v2643_v42 = vadd.f32 %v2827_v41, %v2642_v48 }
 0xb07   :  { %v3563_v43 = vpop.f32.mrf.mxu1 }
 0xb08   :  { %2647 = vst.msk [vmem:[#allocation2] sm:$0x3] %vm2646_vm7, %v2643_v42 }
 0xb09   :  { %3578 = shalt.err (!%p3575_p4)
}
 0xb0a   :  { %2657 = dma.vmem_to_hbm [thread:$0]  %s2655_s28, 32, %s4482_s16, [#allocation3]  }
 0xb0b   :  { %3587 = dma.done.wait [#allocation3], 32  }
 0xb0c   :  { %3588 = vsyncadd [#allocation3], 4294967264 }
 0xb0d   :  { %2661 = vsyncpa [#allocation3], 1 }

</bundles_post_ra>
